<compile_context>
chip_gen: v6e
topology: v6e:2x2x1
jax: 0.10.0
libtpu: 0.0.40
codegen_flags: <defaults>
</compile_context>

<pallas_src>
import functools

import jax
import jax.numpy as jnp
from jax.experimental import pallas as pl
from jax.experimental.pallas import tpu as pltpu

HIDDEN = 512


def _round_up(x, n):
    return ((x + n - 1) // n) * n


# ----------------------------------------------------------------------------
# Pallas kernel: per row-sub-tile MLP (pos dot + merged K=256 fourier dot,
# folded null blend, SiLU, two more matmuls). Sub-tiles are unrolled so their
# MXU / EUP / VPU work can interleave.
# ----------------------------------------------------------------------------
def _encoding_mlp_kernel(four_ref, pos_ref, mask_ref, nullh_ref,
                         w1p_ref, w1f_ref, b1_ref, w2_ref, b2_ref,
                         w3_ref, b3_ref, o_ref, *, sub_rows, n_sub):
    # Resident (constant index_map) operands: load once per grid step.
    nullh = nullh_ref[...]          # (1, H) f32  : null_features @ W1
    w1p = w1p_ref[...]              # (in_dim, H) bf16
    w1f = w1f_ref[...]              # (256, H)    bf16  (merged sin|cos rows)
    b1 = b1_ref[...]                # (1, H) f32
    w2 = w2_ref[...]                # (H, H) bf16
    b2 = b2_ref[...]                # (1, H) f32
    w3 = w3_ref[...]                # (H, out_pad) bf16
    b3 = b3_ref[...]                # (1, out_pad) f32

    for s in range(n_sub):          # unrolled: independent row sub-tiles
        rows = pl.ds(s * sub_rows, sub_rows)

        # --- layer 1: pos dot (K=in_dim) + one merged fourier dot (K=256) ---
        pre = jnp.dot(pos_ref[rows, :], w1p, preferred_element_type=jnp.float32)
        pre = pre + jnp.dot(four_ref[rows, :], w1f,
                            preferred_element_type=jnp.float32)

        # --- null blend folded after the matmul (mask is per-row scalar) ---
        m = mask_ref[rows, :]                              # (sub, 1) f32
        h1 = m * pre + (1.0 - m) * nullh + b1
        h1 = h1 * jax.nn.sigmoid(h1)                       # SiLU in f32

        h2 = jnp.dot(h1.astype(jnp.bfloat16), w2,
                     preferred_element_type=jnp.float32) + b2
        h2 = h2 * jax.nn.sigmoid(h2)

        out = jnp.dot(h2.astype(jnp.bfloat16), w3,
                      preferred_element_type=jnp.float32) + b3
        o_ref[rows, :] = out.astype(o_ref.dtype)


def encoding_mlp_pallas(four_f, pos_f, mask_f, p):
    """four_f: (M, 2*F*coord) bf16, pos_f: (M, in_dim) bf16, mask_f: (M, 1) f32."""
    M, F2 = four_f.shape
    in_dim = pos_f.shape[1]
    H = p["w2"].shape[0]
    out_pad = p["w3p"].shape[1]

    # Row tile: big tiles amortize the ~0.35us/step grid overhead; capped at
    # 1024 for the v7x 64 MiB VMEM budget and to keep >= 2 grid steps at large
    # M (megacore). Tiny M gets a single small tile.
    if M >= 4096:
        tm = 1024
    elif M >= 2048:
        tm = 512
    elif M >= 512:
        tm = 256
    else:
        tm = min(256, _round_up(M, 8))

    # Sub-tiles inside the kernel body (unrolled) so MXU work of sub-tile k+1
    # overlaps the SiLU of sub-tile k.
    if tm >= 512:
        sub_rows = 256
    elif tm >= 256:
        sub_rows = 128
    else:
        sub_rows = tm
    n_sub = tm // sub_rows

    grid = (pl.cdiv(M, tm),)   # ragged final block handled by Pallas masking

    kernel = functools.partial(_encoding_mlp_kernel,
                               sub_rows=sub_rows, n_sub=n_sub)

    out = pl.pallas_call(
        kernel,
        out_shape=jax.ShapeDtypeStruct((M, out_pad), jnp.float32),
        grid=grid,
        in_specs=[
            pl.BlockSpec((tm, F2), lambda i: (i, 0)),       # [sin|cos] features
            pl.BlockSpec((tm, in_dim), lambda i: (i, 0)),   # positive embeddings
            pl.BlockSpec((tm, 1), lambda i: (i, 0)),        # mask
            pl.BlockSpec((1, H), lambda i: (0, 0)),         # null @ W1
            pl.BlockSpec((in_dim, H), lambda i: (0, 0)),    # W1 rows: pos part
            pl.BlockSpec((F2, H), lambda i: (0, 0)),        # W1 rows: sin|cos merged
            pl.BlockSpec((1, H), lambda i: (0, 0)),         # b1
            pl.BlockSpec((H, H), lambda i: (0, 0)),         # W2
            pl.BlockSpec((1, H), lambda i: (0, 0)),         # b2
            pl.BlockSpec((H, out_pad), lambda i: (0, 0)),   # W3 (lane-padded)
            pl.BlockSpec((1, out_pad), lambda i: (0, 0)),   # b3 (lane-padded)
        ],
        out_specs=pl.BlockSpec((tm, out_pad), lambda i: (i, 0)),
        compiler_params=pltpu.CompilerParams(
            dimension_semantics=("parallel",),
            vmem_limit_bytes=64 * 1024 * 1024),
    )(four_f, pos_f, mask_f, p["null_h1"], p["w1_pos"], p["w1_four"], p["b1"],
      p["w2"], p["b2"], p["w3p"], p["b3p"])

    return out


# ----------------------------------------------------------------------------
# Parameters (same layout as the torch module: W1 over [pos | fourier] rows,
# fourier rows ordered [sin0,cos0,sin1,cos1,...] in blocks of 16).
# ----------------------------------------------------------------------------
def init_params(key, in_dim, out_dim, fourier_freqs=8, dtype=jnp.float32):
    position_dim = fourier_freqs * 2 * 16
    d_in = in_dim + position_dim
    H = HIDDEN
    k1, k2, k3, k4, k5 = jax.random.split(key, 5)

    def lin(k, fan_in, fan_out):
        w = jax.random.normal(k, (fan_in, fan_out), dtype) * (1.0 / jnp.sqrt(fan_in))
        b = jnp.zeros((1, fan_out), dtype)
        return w, b

    w1, b1 = lin(k1, d_in, H)
    w2, b2 = lin(k2, H, H)
    w3, b3 = lin(k3, H, out_dim)
    return {
        "w1": w1, "b1": b1, "w2": w2, "b2": b2, "w3": w3, "b3": b3,
        # torch init is zeros; use small nonzero values so the null-blend
        # path is actually exercised by the correctness check.
        "null_positive": 0.1 * jax.random.normal(k4, (in_dim,), dtype),
        "null_position": 0.1 * jax.random.normal(k5, (position_dim,), dtype),
    }


# ----------------------------------------------------------------------------
# One-time param preprocessing (hoisted out of the per-call forward path):
# W1 row gather + sin/cos merge, null@W1 fold, W3/b3 lane padding, bf16 casts.
# ----------------------------------------------------------------------------
def prepare_params(params, coord=16):
    in_dim = params["null_positive"].shape[0]
    position_dim = params["null_position"].shape[0]
    num_freqs = position_dim // (2 * coord)
    out_dim = params["w3"].shape[1]

    w1 = params["w1"].astype(jnp.float32)
    null_cat = jnp.concatenate(
        [params["null_positive"], params["null_position"]]).astype(jnp.float32)
    null_h1 = null_cat[None, :] @ w1                      # (1, H), exact fold

    # Split/permute W1 rows to the kernel layout:
    #   pos rows | [sin f0..f7 (16 coords each)] | [cos f0..f7] (merged K=256).
    w1_pos = w1[:in_dim]
    w1_four = w1[in_dim:]                                 # (2*F*coord, H), torch order
    f_idx = jnp.arange(num_freqs)[:, None] * (2 * coord) + jnp.arange(coord)[None, :]
    w1_sin = w1_four[f_idx.reshape(-1)]
    w1_cos = w1_four[(f_idx + coord).reshape(-1)]
    w1_four_merged = jnp.concatenate([w1_sin, w1_cos], axis=0)

    # Lane-dense output: pad W3/b3 columns to a multiple of 128.
    out_pad = _round_up(out_dim, 128)
    w3p = jnp.pad(params["w3"].astype(jnp.float32), ((0, 0), (0, out_pad - out_dim)))
    b3p = jnp.pad(params["b3"].astype(jnp.float32), ((0, 0), (0, out_pad - out_dim)))

    return {
        "w1_pos": w1_pos.astype(jnp.bfloat16),
        "w1_four": w1_four_merged.astype(jnp.bfloat16),
        "b1": params["b1"].astype(jnp.float32),
        "null_h1": null_h1,
        "w2": params["w2"].astype(jnp.bfloat16),
        "b2": params["b2"].astype(jnp.float32),
        "w3p": w3p.astype(jnp.bfloat16),
        "b3p": b3p,
    }


# ----------------------------------------------------------------------------
# Forward: thin JAX prologue (Fourier angles / sin / cos) + Pallas hot path.
# ----------------------------------------------------------------------------
@functools.partial(jax.jit, static_argnames=("out_dim",))
def encoding_net_forward(prepped, box, box_mask, positive_embeddings, *, out_dim):
    B, num_camera, N, coord = box.shape
    in_dim = positive_embeddings.shape[-1]
    num_freqs = prepped["w1_four"].shape[0] // (2 * coord)
    temperature = 100.0
    M = B * num_camera * N

    # Fourier angles, lane-tiled to (M, num_freqs*coord); single merged
    # [sin | cos] bf16 feature tensor for the K=256 layer-1 dot.
    freq_bands = temperature ** (jnp.arange(num_freqs, dtype=jnp.float32) / num_freqs)
    freq_tiled = jnp.repeat(freq_bands, coord)                       # (128,)
    box_flat = box.reshape(M, coord).astype(jnp.float32)
    angles = jnp.tile(box_flat, (1, num_freqs)) * freq_tiled[None, :]
    four_f = jnp.concatenate([jnp.sin(angles), jnp.cos(angles)],
                             axis=-1).astype(jnp.bfloat16)           # (M, 256)

    pos_f = positive_embeddings.reshape(M, in_dim).astype(jnp.bfloat16)
    mask_f = box_mask.reshape(M, 1).astype(jnp.float32)

    out_flat = encoding_mlp_pallas(four_f, pos_f, mask_f, prepped)
    return out_flat[:, :out_dim].reshape(B, num_camera, N, out_dim)


# ----------------------------------------------------------------------------
# Pure-JAX f32 reference (mirrors the torch module exactly).
# ----------------------------------------------------------------------------
def fourier_embed(x, num_freqs=8, temperature=100.0):
    freq_bands = temperature ** (jnp.arange(num_freqs, dtype=jnp.float32) / num_freqs)
    parts = []
    for i in range(num_freqs):
        parts.append(jnp.sin(freq_bands[i] * x))
        parts.append(jnp.cos(freq_bands[i] * x))
    return jnp.concatenate(parts, axis=-1)


def encoding_net_reference(params, box, box_mask, positive_embeddings):
    num_freqs = params["null_position"].shape[0] // (2 * box.shape[-1])
    xyxy = fourier_embed(box, num_freqs=num_freqs)
    m = box_mask[..., None]
    pos = positive_embeddings * m + (1 - m) * params["null_positive"].reshape(1, 1, 1, -1)
    xyxy = xyxy * m + (1 - m) * params["null_position"].reshape(1, 1, 1, -1)
    x = jnp.concatenate([pos, xyxy], axis=-1)
    h = x @ params["w1"] + params["b1"]
    h = h * jax.nn.sigmoid(h)
    h = h @ params["w2"] + params["b2"]
    h = h * jax.nn.sigmoid(h)
    return h @ params["w3"] + params["b3"]


if __name__ == "__main__":
    in_dim = 32
    out_dim = 64
    fourier_freqs = 8
    B, num_camera, N = 2, 2, 8

    key = jax.random.PRNGKey(0)
    kp, kb, km, ke = jax.random.split(key, 4)

    params = init_params(kp, in_dim, out_dim, fourier_freqs)
    prepped = prepare_params(params)          # hoisted, one-time param prep

    box = jax.random.uniform(kb, (B, num_camera, N, 16), jnp.float32)
    box_mask = (jax.random.uniform(km, (B, num_camera, N)) > 0.5).astype(jnp.float32)
    positive_embeddings = jax.random.normal(ke, (B, num_camera, N, in_dim), jnp.float32)

    out = encoding_net_forward(prepped, box, box_mask, positive_embeddings,
                               out_dim=out_dim)
    out = jax.block_until_ready(out)
    assert out.shape == (B, num_camera, N, out_dim), out.shape

    ref = encoding_net_reference(params, box, box_mask, positive_embeddings)
    max_err = float(jnp.max(jnp.abs(out - ref)))
    # bf16 matmul operands with f32 accumulation over K<=512.
    assert max_err < 3e-2, max_err

    print("KERNEL_OK")
</pallas_src>

<mosaic_0001>
module attributes {stable_mosaic.version = 11 : i64} {
  func.func @_encoding_mlp_kernel(%arg0: i32, %arg1: memref<32x256xbf16, #tpu.memory_space<vmem>>, %arg2: memref<32x32xbf16, #tpu.memory_space<vmem>>, %arg3: memref<32x1xf32, #tpu.memory_space<vmem>>, %arg4: memref<1x512xf32, #tpu.memory_space<vmem>>, %arg5: memref<32x512xbf16, #tpu.memory_space<vmem>>, %arg6: memref<256x512xbf16, #tpu.memory_space<vmem>>, %arg7: memref<1x512xf32, #tpu.memory_space<vmem>>, %arg8: memref<512x512xbf16, #tpu.memory_space<vmem>>, %arg9: memref<1x512xf32, #tpu.memory_space<vmem>>, %arg10: memref<512x128xbf16, #tpu.memory_space<vmem>>, %arg11: memref<1x128xf32, #tpu.memory_space<vmem>>, %arg12: memref<32x128xf32, #tpu.memory_space<vmem>>) attributes {dimension_semantics = [#tpu.dimension_semantics<parallel>], iteration_bounds = array<i64: 1>, scalar_prefetch = 0 : i64, scratch_operands = 0 : i64, tpu.core_type = #tpu.core_type<tc>, window_params = [{transform_indices = @transform_0, window_bounds = array<i64: 32, 256>}, {transform_indices = @transform_1, window_bounds = array<i64: 32, 32>}, {transform_indices = @transform_2, window_bounds = array<i64: 32, 1>}, {pipeline_mode = #tpu.pipeline_mode<synchronous>, transform_indices = @transform_3, window_bounds = array<i64: 1, 512>}, {pipeline_mode = #tpu.pipeline_mode<synchronous>, transform_indices = @transform_4, window_bounds = array<i64: 32, 512>}, {pipeline_mode = #tpu.pipeline_mode<synchronous>, transform_indices = @transform_5, window_bounds = array<i64: 256, 512>}, {pipeline_mode = #tpu.pipeline_mode<synchronous>, transform_indices = @transform_6, window_bounds = array<i64: 1, 512>}, {pipeline_mode = #tpu.pipeline_mode<synchronous>, transform_indices = @transform_7, window_bounds = array<i64: 512, 512>}, {pipeline_mode = #tpu.pipeline_mode<synchronous>, transform_indices = @transform_8, window_bounds = array<i64: 1, 512>}, {pipeline_mode = #tpu.pipeline_mode<synchronous>, transform_indices = @transform_9, window_bounds = array<i64: 512, 128>}, {pipeline_mode = #tpu.pipeline_mode<synchronous>, transform_indices = @transform_10, window_bounds = array<i64: 1, 128>}, {transform_indices = @transform_11, window_bounds = array<i64: 32, 128>}]} {
    %c0 = arith.constant 0 : index
    %c0_0 = arith.constant 0 : index
    %0 = vector.load %arg4[%c0, %c0_0] : memref<1x512xf32, #tpu.memory_space<vmem>>, vector<1x512xf32>
    %c0_1 = arith.constant 0 : index
    %c0_2 = arith.constant 0 : index
    %1 = vector.load %arg5[%c0_1, %c0_2] : memref<32x512xbf16, #tpu.memory_space<vmem>>, vector<32x512xbf16>
    %c0_3 = arith.constant 0 : index
    %c0_4 = arith.constant 0 : index
    %2 = vector.load %arg6[%c0_3, %c0_4] : memref<256x512xbf16, #tpu.memory_space<vmem>>, vector<256x512xbf16>
    %c0_5 = arith.constant 0 : index
    %c0_6 = arith.constant 0 : index
    %3 = vector.load %arg7[%c0_5, %c0_6] : memref<1x512xf32, #tpu.memory_space<vmem>>, vector<1x512xf32>
    %c0_7 = arith.constant 0 : index
    %c0_8 = arith.constant 0 : index
    %4 = vector.load %arg8[%c0_7, %c0_8] : memref<512x512xbf16, #tpu.memory_space<vmem>>, vector<512x512xbf16>
    %c0_9 = arith.constant 0 : index
    %c0_10 = arith.constant 0 : index
    %5 = vector.load %arg9[%c0_9, %c0_10] : memref<1x512xf32, #tpu.memory_space<vmem>>, vector<1x512xf32>
    %c0_11 = arith.constant 0 : index
    %c0_12 = arith.constant 0 : index
    %6 = vector.load %arg10[%c0_11, %c0_12] : memref<512x128xbf16, #tpu.memory_space<vmem>>, vector<512x128xbf16>
    %c0_13 = arith.constant 0 : index
    %c0_14 = arith.constant 0 : index
    %7 = vector.load %arg11[%c0_13, %c0_14] : memref<1x128xf32, #tpu.memory_space<vmem>>, vector<1x128xf32>
    %c0_15 = arith.constant 0 : index
    %c0_16 = arith.constant 0 : index
    %8 = vector.load %arg2[%c0_15, %c0_16] : memref<32x32xbf16, #tpu.memory_space<vmem>>, vector<32x32xbf16>
    %cst = arith.constant dense<0.000000e+00> : vector<32x512xf32>
    %9 = tpu.matmul %8, %1, %cst {dimension_numbers = #tpu.dot_dimension_numbers<[1], [0], [0], [1], [0, 0, 1, 1], [], []>} : vector<32x32xbf16>, vector<32x512xbf16>, vector<32x512xf32> -> vector<32x512xf32>
    %c0_17 = arith.constant 0 : index
    %c0_18 = arith.constant 0 : index
    %10 = vector.load %arg1[%c0_17, %c0_18] : memref<32x256xbf16, #tpu.memory_space<vmem>>, vector<32x256xbf16>
    %cst_19 = arith.constant dense<0.000000e+00> : vector<32x512xf32>
    %11 = tpu.matmul %10, %2, %cst_19 {dimension_numbers = #tpu.dot_dimension_numbers<[1], [0], [0], [1], [0, 0, 1, 1], [], []>} : vector<32x256xbf16>, vector<256x512xbf16>, vector<32x512xf32> -> vector<32x512xf32>
    %12 = arith.addf %9, %11 : vector<32x512xf32>
    %c0_20 = arith.constant 0 : index
    %c0_21 = arith.constant 0 : index
    %13 = vector.load %arg3[%c0_20, %c0_21] : memref<32x1xf32, #tpu.memory_space<vmem>>, vector<32x1xf32>
    %14 = vector.broadcast %13 : vector<32x1xf32> to vector<32x512xf32>
    %15 = arith.mulf %14, %12 : vector<32x512xf32>
    %cst_22 = arith.constant 1.000000e+00 : f32
    %16 = vector.broadcast %cst_22 : f32 to vector<32x1xf32>
    %17 = arith.subf %16, %13 : vector<32x1xf32>
    %18 = vector.broadcast %17 : vector<32x1xf32> to vector<32x512xf32>
    %19 = vector.broadcast %0 : vector<1x512xf32> to vector<32x512xf32>
    %20 = arith.mulf %18, %19 : vector<32x512xf32>
    %21 = arith.addf %15, %20 : vector<32x512xf32>
    %22 = vector.broadcast %3 : vector<1x512xf32> to vector<32x512xf32>
    %23 = arith.addf %21, %22 : vector<32x512xf32>
    %24 = arith.negf %23 : vector<32x512xf32>
    %25 = math.exp %24 : vector<32x512xf32>
    %cst_23 = arith.constant 1.000000e+00 : f32
    %26 = vector.broadcast %cst_23 : f32 to vector<32x512xf32>
    %27 = arith.addf %26, %25 : vector<32x512xf32>
    %28 = arith.divf %26, %27 : vector<32x512xf32>
    %29 = arith.mulf %23, %28 : vector<32x512xf32>
    %30 = arith.truncf %29 : vector<32x512xf32> to vector<32x512xbf16>
    %cst_24 = arith.constant dense<0.000000e+00> : vector<32x512xf32>
    %31 = tpu.matmul %30, %4, %cst_24 {dimension_numbers = #tpu.dot_dimension_numbers<[1], [0], [0], [1], [0, 0, 1, 1], [], []>} : vector<32x512xbf16>, vector<512x512xbf16>, vector<32x512xf32> -> vector<32x512xf32>
    %32 = vector.broadcast %5 : vector<1x512xf32> to vector<32x512xf32>
    %33 = arith.addf %31, %32 : vector<32x512xf32>
    %34 = arith.negf %33 : vector<32x512xf32>
    %35 = math.exp %34 : vector<32x512xf32>
    %cst_25 = arith.constant 1.000000e+00 : f32
    %36 = vector.broadcast %cst_25 : f32 to vector<32x512xf32>
    %37 = arith.addf %36, %35 : vector<32x512xf32>
    %38 = arith.divf %36, %37 : vector<32x512xf32>
    %39 = arith.mulf %33, %38 : vector<32x512xf32>
    %40 = arith.truncf %39 : vector<32x512xf32> to vector<32x512xbf16>
    %cst_26 = arith.constant dense<0.000000e+00> : vector<32x128xf32>
    %41 = tpu.matmul %40, %6, %cst_26 {dimension_numbers = #tpu.dot_dimension_numbers<[1], [0], [0], [1], [0, 0, 1, 1], [], []>} : vector<32x512xbf16>, vector<512x128xbf16>, vector<32x128xf32> -> vector<32x128xf32>
    %42 = vector.broadcast %7 : vector<1x128xf32> to vector<32x128xf32>
    %43 = arith.addf %41, %42 : vector<32x128xf32>
    %c0_27 = arith.constant 0 : index
    %c0_28 = arith.constant 0 : index
    %44 = vector.load %arg12[%c0_27, %c0_28] : memref<32x128xf32, #tpu.memory_space<vmem>>, vector<32x128xf32>
    tpu.vector_store %arg12[%c0_27, %c0_28], %43 {strides = array<i32>} : memref<32x128xf32, #tpu.memory_space<vmem>>, vector<32x128xf32>,
    return
  }
  func.func @transform_0(%arg0: i32) -> (i32, i32) {
    %c0_i32 = arith.constant 0 : i32
    %c0_i32_0 = arith.constant 0 : i32
    return %arg0, %c0_i32 : i32, i32
  }
  func.func @transform_1(%arg0: i32) -> (i32, i32) {
    %c0_i32 = arith.constant 0 : i32
    %c0_i32_0 = arith.constant 0 : i32
    return %arg0, %c0_i32 : i32, i32
  }
  func.func @transform_2(%arg0: i32) -> (i32, i32) {
    %c0_i32 = arith.constant 0 : i32
    %c0_i32_0 = arith.constant 0 : i32
    return %arg0, %c0_i32 : i32, i32
  }
  func.func @transform_3(%arg0: i32) -> (i32, i32) {
    %c0_i32 = arith.constant 0 : i32
    %c0_i32_0 = arith.constant 0 : i32
    %c0_i32_1 = arith.constant 0 : i32
    return %c0_i32, %c0_i32_0 : i32, i32
  }
  func.func @transform_4(%arg0: i32) -> (i32, i32) {
    %c0_i32 = arith.constant 0 : i32
    %c0_i32_0 = arith.constant 0 : i32
    %c0_i32_1 = arith.constant 0 : i32
    return %c0_i32, %c0_i32_0 : i32, i32
  }
  func.func @transform_5(%arg0: i32) -> (i32, i32) {
    %c0_i32 = arith.constant 0 : i32
    %c0_i32_0 = arith.constant 0 : i32
    %c0_i32_1 = arith.constant 0 : i32
    return %c0_i32, %c0_i32_0 : i32, i32
  }
  func.func @transform_6(%arg0: i32) -> (i32, i32) {
    %c0_i32 = arith.constant 0 : i32
    %c0_i32_0 = arith.constant 0 : i32
    %c0_i32_1 = arith.constant 0 : i32
    return %c0_i32, %c0_i32_0 : i32, i32
  }
  func.func @transform_7(%arg0: i32) -> (i32, i32) {
    %c0_i32 = arith.constant 0 : i32
    %c0_i32_0 = arith.constant 0 : i32
    %c0_i32_1 = arith.constant 0 : i32
    return %c0_i32, %c0_i32_0 : i32, i32
  }
  func.func @transform_8(%arg0: i32) -> (i32, i32) {
    %c0_i32 = arith.constant 0 : i32
    %c0_i32_0 = arith.constant 0 : i32
    %c0_i32_1 = arith.constant 0 : i32
    return %c0_i32, %c0_i32_0 : i32, i32
  }
  func.func @transform_9(%arg0: i32) -> (i32, i32) {
    %c0_i32 = arith.constant 0 : i32
    %c0_i32_0 = arith.constant 0 : i32
    %c0_i32_1 = arith.constant 0 : i32
    return %c0_i32, %c0_i32_0 : i32, i32
  }
  func.func @transform_10(%arg0: i32) -> (i32, i32) {
    %c0_i32 = arith.constant 0 : i32
    %c0_i32_0 = arith.constant 0 : i32
    %c0_i32_1 = arith.constant 0 : i32
    return %c0_i32, %c0_i32_0 : i32, i32
  }
  func.func @transform_11(%arg0: i32) -> (i32, i32) {
    %c0_i32 = arith.constant 0 : i32
    %c0_i32_0 = arith.constant 0 : i32
    return %arg0, %c0_i32 : i32, i32
  }
}

</mosaic_0001>

<bundles_post_ra>
// kernel: mul.5
= control target key start
LH: loop header
LB: loop body
LE: loop exit
PB: predicated region body
PF: predicated region fallthrough
CT: control target
= control target key end

     0   :  { %s69_s10 = smov 112   ;;  %s70_s11 = smov 80   ;;  %vm3_vm0 = vcmask 130048   ;;  %vm9_vm1 = vcmask 1048448   ;;  %vm15_vm2 = vcmask 917248   ;;  %vm21_vm3 = vcmask 786048   ;;  %s113_s0 = inlined_call_operand.vmem [shape: f32[8,16], index: 0, kind: input, shape index: {}]   ;;  %s114_s1 = inlined_call_operand.vmem [shape: f32[128], index: 1, kind: output, shape index: {}]  }
   0x1   :  { %v55_v0 = vld [vmem:[%s113_s0 + $0x7] sm:$0x1]   ;;  %v57_v1 = vld [vmem:[%s113_s0 + $0x5] sm:$0x1]   ;;  %v56_v2 = vld [vmem:[%s113_s0 + $0x6] sm:$0x1]  }
   0x2   :  { %7 = vrot.lane.b32.xlu0 %v55_v0, %s69_s10  ;;  %19 = vrot.lane.b32.xlu1 %v57_v1, %s70_s11  ;;  %v58_v3 = vld [vmem:[%s113_s0 + $0x4] sm:$0x1]   ;;  %v2_v4 = vld [vmem:[%s113_s0] sm:$0x1]   ;;  %s71_s18 = smov 96   ;;  %s72_s19 = smov 64  }
   0x3   :  { %4 = vst.msk [vmem:[#allocation0] sm:$0x1] %vm3_vm0, %v2_v4   ;;  %v59_v5 = vld [vmem:[%s113_s0 + $0x3] sm:$0x1]   ;;  %v60_v6 = vld [vmem:[%s113_s0 + $0x2] sm:$0x1]  }
   0x4   :  { %s73_s24 = smov 48   ;;  %s74_s25 = smov 32   ;;  %v61_v7 = vld [vmem:[%s113_s0 + $0x1] sm:$0x1]   ;;  %vm27_vm4 = vcmask 654848   ;;  %vm33_vm5 = vcmask 523648  }
   0x5   :  { %s75_s0 = smov 16   ;;  %vm39_vm6 = vcmask 392448   ;;  %vm45_vm7 = vcmask 261248  }
   0x6   :  { %13 = vrot.lane.b32.xlu0 %v56_v2, %s71_s18  ;;  %25 = vrot.lane.b32.xlu1 %v58_v3, %s72_s19 }
   0xa   :  { %31 = vrot.lane.b32.xlu0 %v59_v5, %s73_s24  ;;  %37 = vrot.lane.b32.xlu1 %v60_v6, %s74_s25 }
   0xe   :  { %43 = vrot.lane.b32.xlu0 %v61_v7, %s75_s0 }
  0x74   :  { %v8_v8 = vpop.permute.xlu0 %7   ;;  %v20_v9 = vpop.permute.xlu1 %19  }
  0x75   :  { %10 = vst.msk [vmem:[#allocation0] sm:$0x1] %vm9_vm1, %v8_v8  }
  0x78   :  { %v14_v10 = vpop.permute.xlu0 %13   ;;  %v26_v11 = vpop.permute.xlu1 %25  }
  0x79   :  { %16 = vst.msk [vmem:[#allocation0] sm:$0x1] %vm15_vm2, %v14_v10  }
  0x7a   :  { %22 = vst.msk [vmem:[#allocation0] sm:$0x1] %vm21_vm3, %v20_v9  }
  0x7b   :  { %28 = vst.msk [vmem:[#allocation0] sm:$0x1] %vm27_vm4, %v26_v11  }
  0x7c   :  { %v32_v12 = vpop.permute.xlu0 %31   ;;  %v38_v13 = vpop.permute.xlu1 %37  }
  0x7d   :  { %34 = vst.msk [vmem:[#allocation0] sm:$0x1] %vm33_vm5, %v32_v12  }
  0x7e   :  { %40 = vst.msk [vmem:[#allocation0] sm:$0x1] %vm39_vm6, %v38_v13  }
  0x80   :  { %v44_v14 = vpop.permute.xlu0 %43  }
  0x81   :  { %46 = vst.msk [vmem:[#allocation0] sm:$0x1] %vm45_vm7, %v44_v14  }
  0x88   :  { %v51_v15 = vld [vmem:[#allocation0] sm:$0x1] }
  0x89   :  { %54 = vst [vmem:[%s114_s1] sm:$0x1] %v51_v15 }

// kernel: encoding_net_forward.1
= control target key start
LH: loop header
LB: loop body
LE: loop exit
PB: predicated region body
PF: predicated region fallthrough
CT: control target
= control target key end

     0   :  { %16 = vsyncpa [#allocation3], 0  ;;  %s3995_s0 = inlined_call_operand.vmem [shape: bf16[32,256], index: 0, kind: input, shape index: {}]   ;;  %s3996_s1 = inlined_call_operand.vmem [shape: bf16[32,32], index: 1, kind: input, shape index: {}]   ;;  %s3997_s2 = inlined_call_operand.vmem [shape: f32[32,1], index: 2, kind: input, shape index: {}]   ;;  %s3998_s3 = inlined_call_operand.vmem [shape: f32[1,512], index: 3, kind: input, shape index: {}]   ;;  %s3999_s4 = inlined_call_operand.vmem [shape: bf16[32,512], index: 4, kind: input, shape index: {}]   ;;  %s4000_s5 = inlined_call_operand.vmem [shape: bf16[256,512], index: 5, kind: input, shape index: {}]   ;;  %s4001_s6 = inlined_call_operand.vmem [shape: f32[1,512], index: 6, kind: input, shape index: {}]   ;;  %s4002_s7 = inlined_call_operand.hbm [shape: bf16[512,512], index: 7, kind: input, shape index: {}]   ;;  %s4003_s8 = inlined_call_operand.vmem [shape: f32[1,512], index: 8, kind: input, shape index: {}]   ;;  %s4004_s9 = inlined_call_operand.hbm [shape: bf16[512,128], index: 9, kind: input, shape index: {}]   ;;  %s4005_s10 = inlined_call_operand.vmem [shape: f32[1,128], index: 10, kind: input, shape index: {}]   ;;  %s4006_s11 = inlined_call_operand.hbm [shape: f32[32,128], index: 11, kind: output, shape index: {}]  }
   0x1   :  { %17 = vsyncpa [#allocation6], 0 }
   0x2   :  { %18 = vsyncpa [#allocation4], 0  ;;  %s3415_s17 = smov [#allocation2]  }
   0x3   :  { %s38_s18 = sshll.u32 %s3415_s17, 4  ;;  %s39_s18 = int_to_ptr.vmem [resolvable:$true] %s38_s18 }
   0x4   :  { %s3357_s19 = scalar_lea.vmem %s39_s18, 16384  ;;  %p3362_p1 = scmp.lt.s32.totalorder %s39_s18, %s39_s18 }
   0x5   :  { %p3358_p0 = scmp.ne.s32.totalorder %s39_s18, %s3357_s19  ;;  %p3363_p2 = scmp.lt.s32.totalorder %s3357_s19, %s3357_s19 }
   0x7   :  { %p3364_p3 = por %p3363_p2, %p3362_p1 }
   0x9   :  { %p3365_p4 = pnand %p3364_p3, %p3358_p0 }
   0xb   :  { %3368 = shalt.err (!%p3365_p4)
}
   0xc   :  { %s3416_s20 = smov 256   ;;  %s3417_s21 = smov 16  }
   0xd   :  { %44 = dma.hbm_to_vmem [thread:$0]  %s4002_s7, 16384, %s39_s18, [#allocation3], %s3416_s20, %s3416_s20, %s3417_s21  }
   0xe   :  { %s3418_s24 = smov [#allocation5]  }
   0xf   :  { %s52_s25 = sshll.u32 %s3418_s24, 4  ;;  %s53_s25 = int_to_ptr.vmem [resolvable:$true] %s52_s25 }
  0x10   :  { %s3377_s26 = scalar_lea.vmem %s53_s25, 4096  ;;  %p3382_p6 = scmp.lt.s32.totalorder %s53_s25, %s53_s25 }
  0x11   :  { %p3378_p5 = scmp.ne.s32.totalorder %s53_s25, %s3377_s26  ;;  %p3383_p7 = scmp.lt.s32.totalorder %s3377_s26, %s3377_s26 }
  0x13   :  { %p3384_p8 = por %p3383_p7, %p3382_p6 }
  0x15   :  { %p3385_p9 = pnand %p3384_p8, %p3378_p5 }
  0x17   :  { %3388 = shalt.err (!%p3385_p9)
}
  0x18   :  { %s3419_s27 = smov 64   ;;  %s3420_s28 = smov 4  }
  0x19   :  { %58 = dma.hbm_to_vmem [thread:$0]  %s4004_s9, 4096, %s53_s25, [#allocation6], %s3419_s27, %s3419_s27, %s3420_s28  }
  0x1a   :  { %3409 = dma.done.wait [#allocation3], 16384  }
  0x1b   :  { %3410 = vsyncadd [#allocation3], 4294950912 }
  0x1c   :  { %3411 = dma.done.wait [#allocation6], 4096  }
  0x1d   :  { %3412 = vsyncadd [#allocation6], 4294963200  ;;  %v3421_v0 = vmov 0   ;;  %v2881_v1 = vld [vmem:[%s4000_s5 + $0xe4] ss:$16 sps:$4 sm:$0xff]   ;;  %v954_v62 = vld [vmem:[%s3997_s2 + $0x8] sm:$0xff] }
  0x1e   :  { %2880 = vset.pattern.permute.xlu1 %v3421_v0  ;;  %2879 = vset.pattern.permute.xlu0 %v3421_v0  ;;  %v2883_v2 = vld [vmem:[%s4000_s5 + $0xec] ss:$16 sps:$4 sm:$0xff]   ;;  %v2885_v3 = vld [vmem:[%s4000_s5 + $0xe0] ss:$16 sps:$4 sm:$0xff]   ;;  %v2886_v4 = vld [vmem:[%s4000_s5 + $0xe8] ss:$16 sps:$4 sm:$0xff]  }
  0x1f   :  { %684 = vmatprep.subr.bf16.mxu0 %v2881_v1  ;;  %737 = vmatprep.subr.bf16.mxu1 %v2883_v2  ;;  %v2887_v5 = vld [vmem:[%s4000_s5 + $0xc4] ss:$16 sps:$4 sm:$0xff]   ;;  %v2889_v6 = vld [vmem:[%s4000_s5 + $0xcc] ss:$16 sps:$4 sm:$0xff]   ;;  %v2891_v7 = vld [vmem:[%s4000_s5 + $0xc0] ss:$16 sps:$4 sm:$0xff]  }
  0x20   :  { %685 = vmatpush1.bf16.msra.mxu0 %v2885_v3  ;;  %738 = vmatpush1.bf16.msra.mxu1 %v2886_v4  ;;  %v2892_v8 = vld [vmem:[%s4000_s5 + $0xc8] ss:$16 sps:$4 sm:$0xff]   ;;  %v2893_v9 = vld [vmem:[%s4000_s5 + $0xa4] ss:$16 sps:$4 sm:$0xff]   ;;  %v2895_v10 = vld [vmem:[%s4000_s5 + $0xac] ss:$16 sps:$4 sm:$0xff]  }
  0x21   :  { %686 = vmatprep.subr.bf16.mxu0 %v2887_v5  ;;  %739 = vmatprep.subr.bf16.mxu1 %v2889_v6  ;;  %v2897_v11 = vld [vmem:[%s4000_s5 + $0xa0] ss:$16 sps:$4 sm:$0xff]   ;;  %v2898_v12 = vld [vmem:[%s4000_s5 + $0xa8] ss:$16 sps:$4 sm:$0xff]   ;;  %v2899_v13 = vld [vmem:[%s4000_s5 + $0x84] ss:$16 sps:$4 sm:$0xff]  }
  0x22   :  { %v2901_v14 = vld [vmem:[%s4000_s5 + $0x8c] ss:$16 sps:$4 sm:$0xff]   ;;  %v2903_v15 = vld [vmem:[%s4000_s5 + $0x80] ss:$16 sps:$4 sm:$0xff]   ;;  %v2904_v16 = vld [vmem:[%s4000_s5 + $0x88] ss:$16 sps:$4 sm:$0xff]  }
  0x23   :  { %v2905_v17 = vld [vmem:[%s4000_s5 + $0x64] ss:$16 sps:$4 sm:$0xff]   ;;  %v2907_v18 = vld [vmem:[%s4000_s5 + $0x6c] ss:$16 sps:$4 sm:$0xff]   ;;  %v2909_v19 = vld [vmem:[%s4000_s5 + $0x60] ss:$16 sps:$4 sm:$0xff]  }
  0x24   :  { %687 = vmatpush1.bf16.msra.mxu0 %v2891_v7  ;;  %740 = vmatpush1.bf16.msra.mxu1 %v2892_v8  ;;  %v2910_v20 = vld [vmem:[%s4000_s5 + $0x68] ss:$16 sps:$4 sm:$0xff]   ;;  %v2911_v21 = vld [vmem:[%s4000_s5 + $0x44] ss:$16 sps:$4 sm:$0xff]   ;;  %v2913_v22 = vld [vmem:[%s4000_s5 + $0x4c] ss:$16 sps:$4 sm:$0xff]  }
  0x25   :  { %688 = vmatprep.subr.bf16.mxu0 %v2893_v9  ;;  %741 = vmatprep.subr.bf16.mxu1 %v2895_v10  ;;  %v2915_v23 = vld [vmem:[%s4000_s5 + $0x40] ss:$16 sps:$4 sm:$0xff]   ;;  %v2916_v24 = vld [vmem:[%s4000_s5 + $0x48] ss:$16 sps:$4 sm:$0xff]   ;;  %v2917_v25 = vld [vmem:[%s4000_s5 + $0x24] ss:$16 sps:$4 sm:$0xff]  }
  0x26   :  { %v2919_v26 = vld [vmem:[%s4000_s5 + $0x2c] ss:$16 sps:$4 sm:$0xff]   ;;  %v2921_v27 = vld [vmem:[%s4000_s5 + $0x20] ss:$16 sps:$4 sm:$0xff]   ;;  %v2922_v28 = vld [vmem:[%s4000_s5 + $0x28] ss:$16 sps:$4 sm:$0xff]  }
  0x27   :  { %v2923_v29 = vld [vmem:[%s4000_s5 + $0x4] ss:$16 sps:$4 sm:$0xff]   ;;  %v2925_v30 = vld [vmem:[%s4000_s5 + $0xc] ss:$16 sps:$4 sm:$0xff]   ;;  %v2927_v31 = vld [vmem:[%s4000_s5] ss:$16 sps:$4 sm:$0xff]  }
  0x28   :  { %689 = vmatpush1.bf16.msra.mxu0 %v2897_v11  ;;  %742 = vmatpush1.bf16.msra.mxu1 %v2898_v12  ;;  %v2928_v32 = vld [vmem:[%s4000_s5 + $0x8] ss:$16 sps:$4 sm:$0xff]   ;;  %v2929_v33 = vld [vmem:[%s4000_s5 + $0x1e4] ss:$16 sps:$4 sm:$0xff]   ;;  %v2931_v34 = vld [vmem:[%s4000_s5 + $0x1ec] ss:$16 sps:$4 sm:$0xff]  }
  0x29   :  { %690 = vmatprep.subr.bf16.mxu0 %v2899_v13  ;;  %743 = vmatprep.subr.bf16.mxu1 %v2901_v14  ;;  %v2933_v35 = vld [vmem:[%s4000_s5 + $0x1e0] ss:$16 sps:$4 sm:$0xff]   ;;  %v2934_v36 = vld [vmem:[%s4000_s5 + $0x1e8] ss:$16 sps:$4 sm:$0xff]   ;;  %v2935_v37 = vld [vmem:[%s4000_s5 + $0x1c4] ss:$16 sps:$4 sm:$0xff]  }
  0x2a   :  { %v2937_v38 = vld [vmem:[%s4000_s5 + $0x1cc] ss:$16 sps:$4 sm:$0xff]   ;;  %v2939_v39 = vld [vmem:[%s4000_s5 + $0x1c0] ss:$16 sps:$4 sm:$0xff]   ;;  %v2940_v40 = vld [vmem:[%s4000_s5 + $0x1c8] ss:$16 sps:$4 sm:$0xff]  }
  0x2b   :  { %v2941_v41 = vld [vmem:[%s4000_s5 + $0x1a4] ss:$16 sps:$4 sm:$0xff]   ;;  %v2943_v42 = vld [vmem:[%s4000_s5 + $0x1ac] ss:$16 sps:$4 sm:$0xff]   ;;  %v2945_v43 = vld [vmem:[%s4000_s5 + $0x1a0] ss:$16 sps:$4 sm:$0xff]  }
  0x2c   :  { %691 = vmatpush1.bf16.msra.mxu0 %v2903_v15  ;;  %744 = vmatpush1.bf16.msra.mxu1 %v2904_v16  ;;  %v2946_v44 = vld [vmem:[%s4000_s5 + $0x1a8] ss:$16 sps:$4 sm:$0xff]   ;;  %v2947_v45 = vld [vmem:[%s4000_s5 + $0x184] ss:$16 sps:$4 sm:$0xff]   ;;  %v2949_v46 = vld [vmem:[%s4000_s5 + $0x18c] ss:$16 sps:$4 sm:$0xff]  }
  0x2d   :  { %692 = vmatprep.subr.bf16.mxu0 %v2905_v17  ;;  %745 = vmatprep.subr.bf16.mxu1 %v2907_v18  ;;  %v2951_v47 = vld [vmem:[%s4000_s5 + $0x180] ss:$16 sps:$4 sm:$0xff]   ;;  %v2952_v48 = vld [vmem:[%s4000_s5 + $0x188] ss:$16 sps:$4 sm:$0xff]   ;;  %v2979_v49 = vld [vmem:[%s3995_s0 + $0x4] ss:$8 sps:$4 sm:$0xff]  }
  0x2e   :  { %v2953_v50 = vld [vmem:[%s4000_s5 + $0x164] ss:$16 sps:$4 sm:$0xff]   ;;  %v2955_v51 = vld [vmem:[%s4000_s5 + $0x16c] ss:$16 sps:$4 sm:$0xff]   ;;  %716 = vmatprep.mubr.bf16.mxu0 %v2979_v49  ;;  %769 = vmatprep.mubr.bf16.mxu1 %v2979_v49  ;;  %v2957_v52 = vld [vmem:[%s4000_s5 + $0x160] ss:$16 sps:$4 sm:$0xff]  }
  0x2f   :  { %v2958_v53 = vld [vmem:[%s4000_s5 + $0x168] ss:$16 sps:$4 sm:$0xff]   ;;  %v2959_v54 = vld [vmem:[%s4000_s5 + $0x144] ss:$16 sps:$4 sm:$0xff]   ;;  %v2961_v55 = vld [vmem:[%s4000_s5 + $0x14c] ss:$16 sps:$4 sm:$0xff]  }
  0x30   :  { %693 = vmatpush1.bf16.msra.mxu0 %v2909_v19  ;;  %746 = vmatpush1.bf16.msra.mxu1 %v2910_v20  ;;  %v2963_v56 = vld [vmem:[%s4000_s5 + $0x140] ss:$16 sps:$4 sm:$0xff]   ;;  %v2964_v57 = vld [vmem:[%s4000_s5 + $0x148] ss:$16 sps:$4 sm:$0xff]   ;;  %v2965_v59 = vld [vmem:[%s4000_s5 + $0x124] ss:$16 sps:$4 sm:$0xff]  }
  0x31   :  { %694 = vmatprep.subr.bf16.mxu0 %v2911_v21  ;;  %747 = vmatprep.subr.bf16.mxu1 %v2913_v22  ;;  %v953_v58 = vld [vmem:[%s3997_s2] sm:$0xff]  ;;  %v2967_v60 = vld [vmem:[%s4000_s5 + $0x12c] ss:$16 sps:$4 sm:$0xff]   ;;  %v2970_v1 = vld [vmem:[%s4000_s5 + $0x128] ss:$16 sps:$4 sm:$0xff]   ;;  %v994_v4 = vsub.f32 1.0, %v954_v62 }
  0x32   :  { %v993_v61 = vsub.f32 1.0, %v953_v58  ;;  %v2969_v63 = vld [vmem:[%s4000_s5 + $0x120] ss:$16 sps:$4 sm:$0xff]   ;;  %959 = vperm.xlu0 %2879, %v953_v58   ;;  %v2971_v2 = vld [vmem:[%s4000_s5 + $0x104] ss:$16 sps:$4 sm:$0xff]   ;;  %v956_v8 = vld [vmem:[%s3997_s2 + $0x18] sm:$0xff] }
  0x33   :  { %v2973_v3 = vld [vmem:[%s4000_s5 + $0x10c] ss:$16 sps:$4 sm:$0xff]   ;;  %v955_v5 = vld [vmem:[%s3997_s2 + $0x10] sm:$0xff]  ;;  %v2976_v7 = vld [vmem:[%s4000_s5 + $0x108] ss:$16 sps:$4 sm:$0xff]   ;;  %v996_v20 = vsub.f32 1.0, %v956_v8 }
  0x34   :  { %695 = vmatpush1.bf16.msra.mxu0 %v2915_v23  ;;  %748 = vmatpush1.bf16.msra.mxu1 %v2916_v24  ;;  %v2975_v6 = vld [vmem:[%s4000_s5 + $0x100] ss:$16 sps:$4 sm:$0xff]   ;;  %v2982_v9 = vld [vmem:[%s3999_s4 + $0x24] ss:$16 sps:$4 sm:$0xff]   ;;  %v2985_v10 = vld [vmem:[%s3999_s4 + $0x2c] ss:$16 sps:$4 sm:$0xff]  }
  0x35   :  { %696 = vmatprep.subr.bf16.mxu0 %v2917_v25  ;;  %749 = vmatprep.subr.bf16.mxu1 %v2919_v26  ;;  %v2977_v11 = vld [vmem:[%s3995_s0] ss:$8 sps:$4 sm:$0xff]   ;;  %v995_v14 = vsub.f32 1.0, %v955_v5  ;;  %v2986_v15 = vld [vmem:[%s3995_s0 + $0x14] ss:$8 sps:$4 sm:$0xff]   ;;  %vm840_vm0 = vcmask 261120  }
  0x36   :  { %999 = vperm.xlu1 %2880, %v993_v61   ;;  %964 = vperm.xlu0 %2879, %v954_v62   ;;  %v2980_v12 = vld [vmem:[%s3999_s4 + $0x20] ss:$16 sps:$4 sm:$0xff]   ;;  %v2983_v13 = vld [vmem:[%s3999_s4 + $0x28] ss:$16 sps:$4 sm:$0xff]   ;;  %v2991_v16 = vld [vmem:[%s3999_s4 + $0x4] ss:$16 sps:$4 sm:$0xff]  }
  0x37   :  { %v2994_v17 = vld [vmem:[%s3999_s4 + $0xc] ss:$16 sps:$4 sm:$0xff]   ;;  %v2989_v18 = vld [vmem:[%s3999_s4] ss:$16 sps:$4 sm:$0xff]   ;;  %v2992_v19 = vld [vmem:[%s3999_s4 + $0x8] ss:$16 sps:$4 sm:$0xff]  }
  0x38   :  { %697 = vmatpush1.bf16.msra.mxu0 %v2921_v27  ;;  %750 = vmatpush1.bf16.msra.mxu1 %v2922_v28  ;;  %v2988_v21 = vld [vmem:[%s3995_s0 + $0x10] ss:$8 sps:$4 sm:$0xff]   ;;  %v2995_v22 = vld [vmem:[%s3996_s1] sm:$0xff]   ;;  %v2996_v23 = vld [vmem:[%s3996_s1 + $0x8] sm:$0xff]  }
  0x39   :  { %698 = vmatprep.subr.bf16.mxu0 %v2923_v29  ;;  %751 = vmatprep.subr.bf16.mxu1 %v2925_v30  ;;  %v2999_v24 = vld [vmem:[#allocation2 + $0xe4] ss:$16 sps:$4 sm:$0xff]   ;;  %v2997_v26 = vld [vmem:[#allocation2 + $0xe0] ss:$16 sps:$4 sm:$0xff]  }
  0x3a   :  { %1004 = vperm.xlu1 %2880, %v994_v4   ;;  %969 = vperm.xlu0 %2879, %v955_v5   ;;  %v3002_v25 = vld [vmem:[#allocation2 + $0x2e4] ss:$16 sps:$4 sm:$0xff]   ;;  %v3000_v27 = vld [vmem:[#allocation2 + $0x2e0] ss:$16 sps:$4 sm:$0xff]  }
  0x3b   :  { %v3005_v28 = vld [vmem:[#allocation2 + $0xc4] ss:$16 sps:$4 sm:$0xff]   ;;  %v3003_v30 = vld [vmem:[#allocation2 + $0xc0] ss:$16 sps:$4 sm:$0xff]  }
  0x3c   :  { %699 = vmatpush1.bf16.msra.mxu0 %v2927_v31  ;;  %752 = vmatpush1.bf16.msra.mxu1 %v2928_v32  ;;  %v3008_v29 = vld [vmem:[#allocation2 + $0x2c4] ss:$16 sps:$4 sm:$0xff]   ;;  %v3006_v31 = vld [vmem:[#allocation2 + $0x2c0] ss:$16 sps:$4 sm:$0xff]  }
  0x3d   :  { %700 = vmatprep.subr.bf16.mxu0 %v2929_v33  ;;  %753 = vmatprep.subr.bf16.mxu1 %v2931_v34  ;;  %v3014_v32 = vld [vmem:[#allocation2 + $0x2a4] ss:$16 sps:$4 sm:$0xff]   ;;  %v3009_v33 = vld [vmem:[#allocation2 + $0xa0] ss:$16 sps:$4 sm:$0xff]  }
  0x3e   :  { %974 = vperm.xlu1 %2880, %v956_v8   ;;  %1009 = vperm.xlu0 %2879, %v995_v14   ;;  %v3012_v34 = vld [vmem:[#allocation2 + $0x2a0] ss:$16 sps:$4 sm:$0xff]   ;;  %v3065_v4 = vld [vmem:[#allocation2 + $0x184] ss:$16 sps:$4 sm:$0xff]  }
  0x3f   :  { %v3033_v49 = vld [vmem:[#allocation2 + $0x20] ss:$16 sps:$4 sm:$0xff]   ;;  %v3068_v5 = vld [vmem:[#allocation2 + $0x384] ss:$16 sps:$4 sm:$0xff]  }
  0x40   :  { %701 = vmatpush2.bf16.msra.mxu0 %v2933_v35  ;;  %754 = vmatpush2.bf16.msra.mxu1 %v2934_v36  ;;  %v3017_v35 = vld [vmem:[#allocation2 + $0x84] ss:$16 sps:$4 sm:$0xff]   ;;  %v3048_v58 = vld [vmem:[#allocation2 + $0x3e0] ss:$16 sps:$4 sm:$0xff]  }
  0x41   :  { %702 = vmatprep.subr.bf16.mxu0 %v2935_v37  ;;  %755 = vmatprep.subr.bf16.mxu1 %v2937_v38  ;;  %v3020_v36 = vld [vmem:[#allocation2 + $0x284] ss:$16 sps:$4 sm:$0xff]   ;;  %v3015_v37 = vld [vmem:[#allocation2 + $0x80] ss:$16 sps:$4 sm:$0xff]  }
  0x42   :  { %1014 = vperm.xlu1 %2880, %v996_v20   ;;  %v3018_v38 = vld [vmem:[#allocation2 + $0x280] ss:$16 sps:$4 sm:$0xff]   ;;  %v3071_v8 = vld [vmem:[#allocation2 + $0x164] ss:$16 sps:$4 sm:$0xff]  }
  0x43   :  { %v3051_v61 = vld [vmem:[#allocation2 + $0x1c0] ss:$16 sps:$4 sm:$0xff]   ;;  %v3089_v20 = vld [vmem:[#allocation2 + $0x104] ss:$16 sps:$4 sm:$0xff]  }
  0x44   :  { %703 = vmatpush2.bf16.msra.mxu0 %v2939_v39  ;;  %756 = vmatpush2.bf16.msra.mxu1 %v2940_v40  ;;  %v3023_v39 = vld [vmem:[#allocation2 + $0x64] ss:$16 sps:$4 sm:$0xff]   ;;  %v3054_v62 = vld [vmem:[#allocation2 + $0x3c0] ss:$16 sps:$4 sm:$0xff]  }
  0x45   :  { %704 = vmatprep.subr.bf16.mxu0 %v2941_v41  ;;  %757 = vmatprep.subr.bf16.mxu1 %v2943_v42  ;;  %v3026_v40 = vld [vmem:[#allocation2 + $0x264] ss:$16 sps:$4 sm:$0xff]   ;;  %v3021_v41 = vld [vmem:[#allocation2 + $0x60] ss:$16 sps:$4 sm:$0xff]  }
  0x46   :  { %v3024_v42 = vld [vmem:[#allocation2 + $0x260] ss:$16 sps:$4 sm:$0xff]  }
  0x47   :  { %v3075_v14 = vld [vmem:[#allocation2 + $0x140] ss:$16 sps:$4 sm:$0xff]  }
  0x48   :  { %705 = vmatpush2.bf16.msra.mxu0 %v2945_v43  ;;  %758 = vmatpush2.bf16.msra.mxu1 %v2946_v44  ;;  %v3029_v43 = vld [vmem:[#allocation2 + $0x44] ss:$16 sps:$4 sm:$0xff]  }
  0x49   :  { %706 = vmatprep.subr.bf16.mxu0 %v2947_v45  ;;  %759 = vmatprep.subr.bf16.mxu1 %v2949_v46  ;;  %v3032_v44 = vld [vmem:[#allocation2 + $0x244] ss:$16 sps:$4 sm:$0xff]   ;;  %v3027_v45 = vld [vmem:[#allocation2 + $0x40] ss:$16 sps:$4 sm:$0xff]  }
  0x4a   :  { %v3030_v46 = vld [vmem:[#allocation2 + $0x240] ss:$16 sps:$4 sm:$0xff]  }
  0x4c   :  { %707 = vmatpush2.bf16.msra.mxu0 %v2951_v47  ;;  %760 = vmatpush2.bf16.msra.mxu1 %v2952_v48  ;;  %v3035_v47 = vld [vmem:[#allocation2 + $0x24] ss:$16 sps:$4 sm:$0xff]  }
  0x4d   :  { %708 = vmatprep.subr.bf16.mxu0 %v2953_v50  ;;  %761 = vmatprep.subr.bf16.mxu1 %v2955_v51  ;;  %v3038_v48 = vld [vmem:[#allocation2 + $0x224] ss:$16 sps:$4 sm:$0xff]   ;;  %v3036_v50 = vld [vmem:[#allocation2 + $0x220] ss:$16 sps:$4 sm:$0xff]  }
  0x4e   :  { %v3041_v51 = vld [vmem:[#allocation2 + $0x4] ss:$16 sps:$4 sm:$0xff]  }
  0x50   :  { %709 = vmatpush2.bf16.msra.mxu0 %v2957_v52  ;;  %762 = vmatpush2.bf16.msra.mxu1 %v2958_v53  ;;  %v3044_v52 = vld [vmem:[#allocation2 + $0x204] ss:$16 sps:$4 sm:$0xff]   ;;  %v3039_v53 = vld [vmem:[#allocation2] ss:$16 sps:$4 sm:$0xff]  }
  0x51   :  { %710 = vmatprep.subr.bf16.mxu0 %v2959_v54  ;;  %763 = vmatprep.subr.bf16.mxu1 %v2961_v55  ;;  %v3042_v54 = vld [vmem:[#allocation2 + $0x200] ss:$16 sps:$4 sm:$0xff]   ;;  %v3047_v55 = vld [vmem:[#allocation2 + $0x1e4] ss:$16 sps:$4 sm:$0xff]  }
  0x54   :  { %711 = vmatpush2.bf16.msra.mxu0 %v2963_v56  ;;  %764 = vmatpush2.bf16.msra.mxu1 %v2964_v57  ;;  %v3050_v56 = vld [vmem:[#allocation2 + $0x3e4] ss:$16 sps:$4 sm:$0xff]   ;;  %v3045_v57 = vld [vmem:[#allocation2 + $0x1e0] ss:$16 sps:$4 sm:$0xff]  }
  0x55   :  { %712 = vmatprep.subr.bf16.mxu0 %v2965_v59  ;;  %765 = vmatprep.subr.bf16.mxu1 %v2967_v60  ;;  %v3053_v59 = vld [vmem:[#allocation2 + $0x1c4] ss:$16 sps:$4 sm:$0xff]  }
  0x56   :  { %v3056_v60 = vld [vmem:[#allocation2 + $0x3c4] ss:$16 sps:$4 sm:$0xff]  }
  0x58   :  { %713 = vmatpush2.bf16.msra.mxu0 %v2969_v63  ;;  %766 = vmatpush2.bf16.msra.mxu1 %v2970_v1  ;;  %v3059_v63 = vld [vmem:[#allocation2 + $0x1a4] ss:$16 sps:$4 sm:$0xff]  }
  0x59   :  { %714 = vmatprep.subr.bf16.mxu0 %v2971_v2  ;;  %767 = vmatprep.subr.bf16.mxu1 %v2973_v3  ;;  %v3062_v1 = vld [vmem:[#allocation2 + $0x3a4] ss:$16 sps:$4 sm:$0xff]   ;;  %v3057_v2 = vld [vmem:[#allocation2 + $0x1a0] ss:$16 sps:$4 sm:$0xff]  }
  0x5a   :  { %v3060_v3 = vld [vmem:[#allocation2 + $0x3a0] ss:$16 sps:$4 sm:$0xff]  }
  0x5c   :  { %715 = vmatpush2.bf16.msra.mxu0 %v2975_v6  ;;  %768 = vmatpush2.bf16.msra.mxu1 %v2976_v7  ;;  %v3063_v6 = vld [vmem:[#allocation2 + $0x180] ss:$16 sps:$4 sm:$0xff]  }
  0x5d   :  { %859 = vmatprep.subr.bf16.mxu0 %v2982_v9  ;;  %912 = vmatprep.subr.bf16.mxu1 %v2985_v10  ;;  %v3066_v7 = vld [vmem:[#allocation2 + $0x380] ss:$16 sps:$4 sm:$0xff]   ;;  %v3074_v9 = vld [vmem:[#allocation2 + $0x364] ss:$16 sps:$4 sm:$0xff]  }
  0x5e   :  { %v3069_v10 = vld [vmem:[#allocation2 + $0x160] ss:$16 sps:$4 sm:$0xff]  }
  0x5f   :  { %717 = vmatmul.mubr.bf16.vlgmr.msra.gmra.mxu0 %v2977_v11  ;;  %770 = vmatmul.mubr.bf16.vlgmr.msra.gmra.mxu1 %v2977_v11  ;;  %v3072_v11 = vld [vmem:[#allocation2 + $0x360] ss:$16 sps:$4 sm:$0xff]  }
  0x60   :  { %860 = vmatpush1.bf16.msra.mxu0 %v2980_v12  ;;  %913 = vmatpush1.bf16.msra.mxu1 %v2983_v13  ;;  %v3077_v12 = vld [vmem:[#allocation2 + $0x144] ss:$16 sps:$4 sm:$0xff]  }
  0x61   :  { %726 = vmatprep.mubr.bf16.mxu0 %v2986_v15  ;;  %779 = vmatprep.mubr.bf16.mxu1 %v2986_v15  ;;  %v3080_v13 = vld [vmem:[#allocation2 + $0x344] ss:$16 sps:$4 sm:$0xff]   ;;  %v3078_v15 = vld [vmem:[#allocation2 + $0x340] ss:$16 sps:$4 sm:$0xff]  }
  0x62   :  { %861 = vmatprep.subr.bf16.mxu0 %v2991_v16  ;;  %914 = vmatprep.subr.bf16.mxu1 %v2994_v17  ;;  %v3081_v16 = vld [vmem:[#allocation2 + $0x120] ss:$16 sps:$4 sm:$0xff]   ;;  %v3083_v17 = vld [vmem:[#allocation2 + $0x124] ss:$16 sps:$4 sm:$0xff]  }
  0x64   :  { %862 = vmatpush1.bf16.msra.mxu0 %v2989_v18  ;;  %915 = vmatpush1.bf16.msra.mxu1 %v2992_v19  ;;  %v3084_v18 = vld [vmem:[#allocation2 + $0x320] ss:$16 sps:$4 sm:$0xff]   ;;  %v3086_v19 = vld [vmem:[#allocation2 + $0x324] ss:$16 sps:$4 sm:$0xff]  }
  0x65   :  { %1888 = vmatprep.subr.bf16.mxu0 %v2999_v24  ;;  %1941 = vmatprep.subr.bf16.mxu1 %v3002_v25  ;;  %v3095_v24 = vld [vmem:[#allocation2 + $0xec] ss:$16 sps:$4 sm:$0xff]  }
  0x66   :  { %v3098_v25 = vld [vmem:[#allocation2 + $0x2ec] ss:$16 sps:$4 sm:$0xff]  }
  0x67   :  { %727 = vmatmul.mubr.bf16.gmra.mxu0 %v2988_v21  ;;  %780 = vmatmul.mubr.bf16.gmra.mxu1 %v2988_v21  ;;  %v3092_v21 = vld [vmem:[#allocation2 + $0x304] ss:$16 sps:$4 sm:$0xff]  }
  0x68   :  { %879 = vmatprep.mubr.bf16.mxu0 %v3421_v0  ;;  %932 = vmatprep.mubr.bf16.mxu1 %v3421_v0 }
  0x6f   :  { %2616 = vmatmul.mubr.msk.bf16.vlgmr.msra.gmra.mxu0 %vm840_vm0, %v2995_v22  ;;  %2618 = vmatmul.mubr.msk.bf16.vlgmr.msra.gmra.mxu1 %vm840_vm0, %v2995_v22  ;;  %v3087_v22 = vld [vmem:[#allocation2 + $0x100] ss:$16 sps:$4 sm:$0xff]  }
  0x70   :  { %889 = vmatprep.mubr.bf16.mxu0 %v3421_v0  ;;  %942 = vmatprep.mubr.bf16.mxu1 %v3421_v0  ;;  %v3011_v0 = vld [vmem:[#allocation2 + $0xa4] ss:$16 sps:$4 sm:$0xff]  }
  0x71   :  { %1889 = vmatpush1.bf16.msra.mxu0 %v2997_v26  ;;  %1942 = vmatpush1.bf16.msra.mxu1 %v3000_v27 }
  0x72   :  { %1890 = vmatprep.subr.bf16.mxu0 %v3005_v28  ;;  %1943 = vmatprep.subr.bf16.mxu1 %v3008_v29  ;;  %v1018_v29 = vlaneseq }
  0x75   :  { %1891 = vmatpush1.bf16.msra.mxu0 %v3003_v30  ;;  %1944 = vmatpush1.bf16.msra.mxu1 %v3006_v31 }
  0x76   :  { %1892 = vmatprep.subr.bf16.mxu0 %v3011_v0  ;;  %1945 = vmatprep.subr.bf16.mxu1 %v3014_v32 }
  0x77   :  { %2617 = vmatmul.mubr.msk.bf16.gmra.mxu0 %vm840_vm0, %v2996_v23  ;;  %2619 = vmatmul.mubr.msk.bf16.gmra.mxu1 %vm840_vm0, %v2996_v23  ;;  %v3090_v23 = vld [vmem:[#allocation2 + $0x300] ss:$16 sps:$4 sm:$0xff]  }
  0x79   :  { %1893 = vmatpush1.bf16.msra.mxu0 %v3009_v33  ;;  %1946 = vmatpush1.bf16.msra.mxu1 %v3012_v34  ;;  %v1019_v33 = vshrl.u32 %v1018_v29, 7 }
  0x7a   :  { %1894 = vmatprep.subr.bf16.mxu0 %v3017_v35  ;;  %1947 = vmatprep.subr.bf16.mxu1 %v3020_v36 }
  0x7d   :  { %1895 = vmatpush1.bf16.msra.mxu0 %v3015_v37  ;;  %1948 = vmatpush1.bf16.msra.mxu1 %v3018_v38 }
  0x7e   :  { %1896 = vmatprep.subr.bf16.mxu0 %v3023_v39  ;;  %1949 = vmatprep.subr.bf16.mxu1 %v3026_v40  ;;  %v3753_v39 = vsub.s32 0, %v1019_v33  ;;  %v3755_v40 = vsub.s32 2, %v1019_v33 }
  0x81   :  { %1897 = vmatpush1.bf16.msra.mxu0 %v3021_v41  ;;  %1950 = vmatpush1.bf16.msra.mxu1 %v3024_v42  ;;  %v3757_v41 = vsub.s32 1, %v1019_v33  ;;  %v3759_v42 = vsub.s32 3, %v1019_v33 }
  0x82   :  { %1898 = vmatprep.subr.bf16.mxu0 %v3029_v43  ;;  %1951 = vmatprep.subr.bf16.mxu1 %v3032_v44  ;;  %v68_v43 = vld [vmem:[%s3998_s3] sm:$0xf] }
  0x85   :  { %1899 = vmatpush1.bf16.msra.mxu0 %v3027_v45  ;;  %1952 = vmatpush1.bf16.msra.mxu1 %v3030_v46 }
  0x86   :  { %1900 = vmatprep.subr.bf16.mxu0 %v3035_v47  ;;  %1953 = vmatprep.subr.bf16.mxu1 %v3038_v48 }
  0x89   :  { %1901 = vmatpush1.bf16.msra.mxu0 %v3033_v49  ;;  %1954 = vmatpush1.bf16.msra.mxu1 %v3036_v50  ;;  %v3775_v50 = vrot.slane %v68_v43, %v3753_v39 }
  0x8a   :  { %1902 = vmatprep.subr.bf16.mxu0 %v3041_v51  ;;  %1955 = vmatprep.subr.bf16.mxu1 %v3044_v52  ;;  %v3778_v51 = vrot.slane %v68_v43, %v3755_v40  ;;  %v141_v52 = vld [vmem:[%s4001_s6] sm:$0xf] }
  0x8d   :  { %1903 = vmatpush1.bf16.msra.mxu0 %v3039_v53  ;;  %1956 = vmatpush1.bf16.msra.mxu1 %v3042_v54  ;;  %v3784_v53 = vrot.slane %v68_v43, %v3757_v41  ;;  %v3787_v54 = vrot.slane %v68_v43, %v3759_v42 }
  0x8e   :  { %1904 = vmatprep.subr.bf16.mxu0 %v3047_v55  ;;  %1957 = vmatprep.subr.bf16.mxu1 %v3050_v56 }
  0x91   :  { %1905 = vmatpush2.bf16.msra.mxu0 %v3045_v57  ;;  %1958 = vmatpush2.bf16.msra.mxu1 %v3048_v58  ;;  %v3794_v58 = vrot.slane %v141_v52, %v3753_v39 }
  0x92   :  { %1906 = vmatprep.subr.bf16.mxu0 %v3053_v59  ;;  %1959 = vmatprep.subr.bf16.mxu1 %v3056_v60  ;;  %v3797_v60 = vrot.slane %v141_v52, %v3755_v40 }
  0x95   :  { %1907 = vmatpush2.bf16.msra.mxu0 %v3051_v61  ;;  %1960 = vmatpush2.bf16.msra.mxu1 %v3054_v62  ;;  %v3800_v61 = vrot.slane %v141_v52, %v3757_v41 }
  0x96   :  { %1908 = vmatprep.subr.bf16.mxu0 %v3059_v63  ;;  %1961 = vmatprep.subr.bf16.mxu1 %v3062_v1 }
  0x99   :  { %1909 = vmatpush2.bf16.msra.mxu0 %v3057_v2  ;;  %1962 = vmatpush2.bf16.msra.mxu1 %v3060_v3 }
  0x9a   :  { %1910 = vmatprep.subr.bf16.mxu0 %v3065_v4  ;;  %1963 = vmatprep.subr.bf16.mxu1 %v3068_v5 }
  0x9d   :  { %1911 = vmatpush2.bf16.msra.mxu0 %v3063_v6  ;;  %1964 = vmatpush2.bf16.msra.mxu1 %v3066_v7 }
  0x9e   :  { %1912 = vmatprep.subr.bf16.mxu0 %v3071_v8  ;;  %1965 = vmatprep.subr.bf16.mxu1 %v3074_v9 }
  0xa1   :  { %1913 = vmatpush2.bf16.msra.mxu0 %v3069_v10  ;;  %1966 = vmatpush2.bf16.msra.mxu1 %v3072_v11  ;;  %v3810_v10 = vrot.slane %v141_v52, %v3759_v42 }
  0xa2   :  { %1914 = vmatprep.subr.bf16.mxu0 %v3077_v12  ;;  %1967 = vmatprep.subr.bf16.mxu1 %v3080_v13 }
  0xa5   :  { %1915 = vmatpush2.bf16.msra.mxu0 %v3075_v14  ;;  %1968 = vmatpush2.bf16.msra.mxu1 %v3078_v15 }
  0xa6   :  { %1916 = vmatprep.subr.bf16.mxu0 %v3083_v17  ;;  %1969 = vmatprep.subr.bf16.mxu1 %v3086_v19 }
  0xa9   :  { %1917 = vmatpush2.bf16.msra.mxu0 %v3081_v16  ;;  %1970 = vmatpush2.bf16.msra.mxu1 %v3084_v18 }
  0xaa   :  { %1918 = vmatprep.subr.bf16.mxu0 %v3089_v20  ;;  %1971 = vmatprep.subr.bf16.mxu1 %v3092_v21 }
  0xad   :  { %1919 = vmatpush2.bf16.msra.mxu0 %v3087_v22  ;;  %1972 = vmatpush2.bf16.msra.mxu1 %v3090_v23  ;;  %v960_v26 = vpop.permute.xlu0 %959 }
  0xae   :  { %1994 = vmatprep.subr.bf16.mxu0 %v3095_v24  ;;  %2047 = vmatprep.subr.bf16.mxu1 %v3098_v25 }
  0xb1   :  { %v3743_v34 = vpop.permute.xlu0 %964  ;;  %v1000_v46 = vpop.permute.xlu1 %999 }
  0xb2   :  { %v1038_v62 = vmul.f32 %v3775_v50, %v1000_v46  ;;  %v1040_v63 = vmul.f32 %v3778_v51, %v1000_v46  ;;  %v1039_v5 = vmul.f32 %v3784_v53, %v1000_v46  ;;  %v1041_v6 = vmul.f32 %v3787_v54, %v1000_v46 }
  0xb5   :  { %v3768_v47 = vpop.permute.xlu0 %969  ;;  %v1005_v1 = vpop.permute.xlu1 %1004 }
  0xb6   :  { %v1042_v7 = vmul.f32 %v3775_v50, %v1005_v1  ;;  %v1043_v15 = vmul.f32 %v3784_v53, %v1005_v1  ;;  %v1044_v16 = vmul.f32 %v3778_v51, %v1005_v1  ;;  %v1045_v17 = vmul.f32 %v3787_v54, %v1005_v1 }
  0xb9   :  { %v3804_v4 = vpop.permute.xlu0 %1009 }
  0xba   :  { %v1046_v20 = vmul.f32 %v3775_v50, %v3804_v4  ;;  %v1048_v29 = vmul.f32 %v3778_v51, %v3804_v4 }
 0x11f   :  { %v718_v27 = vpop.f32.mrf.mxu0  ;;  %v771_v28 = vpop.f32.mrf.mxu1 }
 0x121   :  { %v720_v30 = vpop.f32.mrf.mxu0  ;;  %v773_v31 = vpop.f32.mrf.mxu1 }
 0x123   :  { %v722_v0 = vpop.f32.mrf.mxu0  ;;  %v775_v32 = vpop.f32.mrf.mxu1 }
 0x125   :  { %v3745_v35 = vpop.f32.mrf.mxu0  ;;  %v3747_v36 = vpop.f32.mrf.mxu1 }
 0x127   :  { %v3749_v37 = vpop.f32.mrf.mxu0  ;;  %v3751_v38 = vpop.f32.mrf.mxu1 }
 0x129   :  { %v3764_v44 = vpop.f32.mrf.mxu0  ;;  %v3766_v45 = vpop.f32.mrf.mxu1 }
 0x12b   :  { %v3770_v48 = vpop.f32.mrf.mxu0  ;;  %v3772_v49 = vpop.f32.mrf.mxu1 }
 0x12d   :  { %v3789_v55 = vpop.f32.mrf.mxu0  ;;  %v3791_v56 = vpop.f32.mrf.mxu1 }
 0x12f   :  { %v881_v57 = vpop.f32.mrf.mxu0  ;;  %v934_v59 = vpop.f32.mrf.mxu1 }
 0x130   :  { %v882_v2 = vadd.f32 %v881_v57, %v718_v27  ;;  %v935_v3 = vadd.f32 %v934_v59, %v771_v28  ;;  %v3819_v28 = vmul.f32 %v3784_v53, %v3804_v4 }
 0x131   :  { %v883_v8 = vpop.f32.mrf.mxu0  ;;  %v936_v9 = vpop.f32.mrf.mxu1 }
 0x132   :  { %v977_v11 = vmul.f32 %v960_v26, %v882_v2  ;;  %v979_v12 = vmul.f32 %v960_v26, %v935_v3  ;;  %v884_v13 = vadd.f32 %v883_v8, %v720_v30  ;;  %v937_v14 = vadd.f32 %v936_v9, %v773_v31 }
 0x133   :  { %v885_v18 = vpop.f32.mrf.mxu0  ;;  %v938_v19 = vpop.f32.mrf.mxu1 }
 0x134   :  { %v1054_v21 = vadd.f32 %v1038_v62, %v977_v11  ;;  %v1056_v22 = vadd.f32 %v1040_v63, %v979_v12  ;;  %v978_v23 = vmul.f32 %v960_v26, %v884_v13  ;;  %v980_v24 = vmul.f32 %v960_v26, %v937_v14 }
 0x135   :  { %v886_v25 = vadd.f32 %v885_v18, %v722_v0  ;;  %v939_v27 = vadd.f32 %v938_v19, %v775_v32  ;;  %v887_v30 = vpop.f32.mrf.mxu0  ;;  %v940_v31 = vpop.f32.mrf.mxu1 }
 0x136   :  { %v3824_v33 = vadd.f32 %v3794_v58, %v1054_v21  ;;  %v3827_v43 = vadd.f32 %v3797_v60, %v1056_v22  ;;  %v1055_v46 = vadd.f32 %v1039_v5, %v978_v23  ;;  %v1057_v52 = vadd.f32 %v1041_v6, %v980_v24  ;;  %v975_v18 = vpop.permute.xlu1 %974 }
 0x137   :  { %v981_v26 = vmul.f32 %v3743_v34, %v886_v25  ;;  %v983_v0 = vmul.f32 %v3743_v34, %v939_v27  ;;  %v888_v32 = vadd.f32 %v887_v30, %v3745_v35  ;;  %v941_v57 = vadd.f32 %v940_v31, %v3747_v36  ;;  %v891_v59 = vpop.f32.mrf.mxu0  ;;  %v944_v62 = vpop.f32.mrf.mxu1 }
 0x138   :  { %v2620_v63 = vmul.f32 -1.442695, %v3824_v33  ;;  %v2622_v1 = vmul.f32 -1.442695, %v3827_v43  ;;  %v3836_v2 = vadd.f32 %v3800_v61, %v1055_v46  ;;  %v3839_v3 = vadd.f32 %v3810_v10, %v1057_v52 }
 0x139   :  { %v1058_v5 = vadd.f32 %v1042_v7, %v981_v26  ;;  %v1060_v6 = vadd.f32 %v1044_v16, %v983_v0  ;;  %v982_v8 = vmul.f32 %v3743_v34, %v888_v32  ;;  %v984_v35 = vmul.f32 %v3743_v34, %v941_v57  ;;  %v893_v9 = vpop.f32.mrf.mxu0  ;;  %v946_v36 = vpop.f32.mrf.mxu1 }
 0x13a   :  { %3221 = vpow2.f32 %v2620_v63  ;;  %v2621_v11 = vmul.f32 -1.442695, %v3836_v2  ;;  %v2623_v12 = vmul.f32 -1.442695, %v3839_v3  ;;  %v892_v13 = vadd.f32 %v891_v59, %v3749_v37 }
 0x13b   :  { %3223 = vpow2.f32 %v2622_v1  ;;  %v3847_v14 = vadd.f32 %v3794_v58, %v1058_v5  ;;  %v3850_v7 = vadd.f32 %v3797_v60, %v1060_v6  ;;  %v1059_v16 = vadd.f32 %v1043_v15, %v982_v8  ;;  %v895_v22 = vpop.f32.mrf.mxu0  ;;  %v948_v25 = vpop.f32.mrf.mxu1 }
 0x13c   :  { %3225 = vpow2.f32 %v2621_v11  ;;  %v1061_v34 = vadd.f32 %v1045_v17, %v984_v35  ;;  %v985_v19 = vmul.f32 %v3768_v47, %v892_v13  ;;  %v945_v21 = vadd.f32 %v944_v62, %v3751_v38 }
 0x13d   :  { %3227 = vpow2.f32 %v2623_v12  ;;  %v2624_v23 = vmul.f32 -1.442695, %v3847_v14  ;;  %v2626_v37 = vmul.f32 -1.442695, %v3850_v7  ;;  %v3857_v24 = vadd.f32 %v3800_v61, %v1059_v16  ;;  %v897_v32 = vpop.f32.mrf.mxu0  ;;  %v950_v59 = vpop.f32.mrf.mxu1 }
 0x13e   :  { %v3860_v27 = vadd.f32 %v3810_v10, %v1061_v34  ;;  %v1062_v15 = vadd.f32 %v1046_v20, %v985_v19  ;;  %v987_v17 = vmul.f32 %v3768_v47, %v945_v21  ;;  %v894_v30 = vadd.f32 %v893_v9, %v3764_v44 }
 0x13f   :  { %3229 = vpow2.f32 %v2624_v23  ;;  %v2625_v38 = vmul.f32 -1.442695, %v3857_v24  ;;  %v947_v31 = vadd.f32 %v946_v36, %v3766_v45  ;;  %v896_v46 = vadd.f32 %v895_v22, %v3770_v48  ;;  %v1015_v45 = vpop.permute.xlu1 %1014 }
 0x140   :  { %3231 = vpow2.f32 %v2626_v37  ;;  %v2627_v52 = vmul.f32 -1.442695, %v3860_v27  ;;  %v3869_v26 = vadd.f32 %v3794_v58, %v1062_v15  ;;  %v1064_v0 = vadd.f32 %v1048_v29, %v987_v17 }
 0x141   :  { %v1049_v20 = vmul.f32 %v3787_v54, %v3804_v4  ;;  %3233 = vpow2.f32 %v2625_v38  ;;  %v986_v44 = vmul.f32 %v3768_v47, %v894_v30  ;;  %v988_v57 = vmul.f32 %v3768_v47, %v947_v31 }
 0x142   :  { %3235 = vpow2.f32 %v2627_v52  ;;  %v3876_v48 = vadd.f32 %v3797_v60, %v1064_v0  ;;  %v989_v62 = vmul.f32 %v975_v18, %v896_v46  ;;  %v949_v63 = vadd.f32 %v948_v25, %v3772_v49 }
 0x143   :  { %v2628_v29 = vmul.f32 -1.442695, %v3869_v26  ;;  %v1063_v1 = vadd.f32 %v3819_v28, %v986_v44  ;;  %v1065_v5 = vadd.f32 %v1049_v20, %v988_v57  ;;  %v898_v4 = vadd.f32 %v897_v32, %v3789_v55 }
 0x144   :  { %v2630_v6 = vmul.f32 -1.442695, %v3876_v48  ;;  %v951_v47 = vadd.f32 %v950_v59, %v3791_v56  ;;  %v1050_v8 = vmul.f32 %v3775_v50, %v1015_v45  ;;  %v991_v9 = vmul.f32 %v975_v18, %v949_v63 }
 0x145   :  { %v3886_v35 = vadd.f32 %v3800_v61, %v1063_v1  ;;  %v1052_v36 = vmul.f32 %v3778_v51, %v1015_v45  ;;  %v3890_v49 = vadd.f32 %v3810_v10, %v1065_v5  ;;  %3237 = vpow2.f32 %v2628_v29 }
 0x146   :  { %v1066_v55 = vadd.f32 %v1050_v8, %v989_v62  ;;  %v990_v12 = vmul.f32 %v975_v18, %v898_v4  ;;  %3239 = vpow2.f32 %v2630_v6  ;;  %v992_v56 = vmul.f32 %v975_v18, %v951_v47 }
 0x147   :  { %v3222_v11 = vpop.eup %3221  ;;  %v2629_v28 = vmul.f32 -1.442695, %v3886_v35  ;;  %v1051_v19 = vmul.f32 %v3784_v53, %v1015_v45  ;;  %v1068_v21 = vadd.f32 %v1052_v36, %v991_v9  ;;  %v1053_v23 = vmul.f32 %v3787_v54, %v1015_v45 }
 0x148   :  { %v3224_v13 = vpop.eup %3223  ;;  %v1155_v16 = vadd.f32 1.0, %v3222_v11  ;;  %v2631_v37 = vmul.f32 -1.442695, %v3890_v49  ;;  %v3897_v15 = vadd.f32 %v3794_v58, %v1066_v55 }
 0x149   :  { %v3226_v50 = vpop.eup %3225  ;;  %v1157_v34 = vadd.f32 1.0, %v3224_v13  ;;  %3241 = vpow2.f32 %v2629_v28  ;;  %v1067_v17 = vadd.f32 %v1051_v19, %v990_v12  ;;  %v1069_v30 = vadd.f32 %v1053_v23, %v992_v56  ;;  %v3096_v23 = vld [vmem:[#allocation2 + $0x2e8] ss:$16 sps:$4 sm:$0xff]  }
 0x14a   :  { %v3228_v51 = vpop.eup %3227  ;;  %3243 = vrcp.f32 %v1155_v16  ;;  %v1156_v22 = vadd.f32 1.0, %v3226_v50  ;;  %v3900_v31 = vadd.f32 %v3797_v60, %v1068_v21  ;;  %v2632_v32 = vmul.f32 -1.442695, %v3897_v15 }
 0x14b   :  { %3245 = vrcp.f32 %v1157_v34  ;;  %v1158_v25 = vadd.f32 1.0, %v3228_v51  ;;  %v3904_v58 = vadd.f32 %v3800_v61, %v1067_v17  ;;  %v3907_v44 = vadd.f32 %v3810_v10, %v1069_v30  ;;  %v3093_v51 = vld [vmem:[#allocation2 + $0xe8] ss:$16 sps:$4 sm:$0xff]  }
 0x14c   :  { %v3230_v18 = vpop.eup %3229  ;;  %3247 = vrcp.f32 %v1156_v22  ;;  %v2634_v60 = vmul.f32 -1.442695, %v3900_v31 }
 0x14d   :  { %v3232_v38 = vpop.eup %3231  ;;  %3249 = vrcp.f32 %v1158_v25  ;;  %v1159_v53 = vadd.f32 1.0, %v3230_v18  ;;  %v2633_v57 = vmul.f32 -1.442695, %v3904_v58  ;;  %v2635_v45 = vmul.f32 -1.442695, %v3907_v44 }
 0x14e   :  { %v3234_v46 = vpop.eup %3233  ;;  %v1161_v52 = vadd.f32 1.0, %v3232_v38  ;;  %3251 = vpow2.f32 %v2631_v37  ;;  %v3099_v18 = vld [vmem:[#allocation2 + $0xc8] ss:$16 sps:$4 sm:$0xff]  }
 0x14f   :  { %v3236_v54 = vpop.eup %3235  ;;  %3253 = vrcp.f32 %v1159_v53  ;;  %v1160_v0 = vadd.f32 1.0, %v3234_v46  ;;  %v3102_v38 = vld [vmem:[#allocation2 + $0x2c8] ss:$16 sps:$4 sm:$0xff]   ;;  %v3107_v53 = vld [vmem:[#allocation2 + $0xac] ss:$16 sps:$4 sm:$0xff]  }
 0x150   :  { %3255 = vrcp.f32 %v1161_v52  ;;  %v1162_v20 = vadd.f32 1.0, %v3236_v54  ;;  %v3110_v46 = vld [vmem:[#allocation2 + $0x2ac] ss:$16 sps:$4 sm:$0xff]   ;;  %v3105_v52 = vld [vmem:[#allocation2 + $0xa8] ss:$16 sps:$4 sm:$0xff]  }
 0x151   :  { %3257 = vrcp.f32 %v1160_v0  ;;  %v3108_v54 = vld [vmem:[#allocation2 + $0x2a8] ss:$16 sps:$4 sm:$0xff]   ;;  %v3113_v0 = vld [vmem:[#allocation2 + $0x8c] ss:$16 sps:$4 sm:$0xff]  }
 0x152   :  { %3259 = vrcp.f32 %v1162_v20  ;;  %v3238_v59 = vpop.eup %3237  ;;  %v3111_v20 = vld [vmem:[#allocation2 + $0x88] ss:$16 sps:$4 sm:$0xff]  }
 0x153   :  { %3261 = vpow2.f32 %v2632_v32  ;;  %v3240_v62 = vpop.eup %3239  ;;  %v1163_v47 = vadd.f32 1.0, %v3238_v59  ;;  %v3116_v32 = vld [vmem:[#allocation2 + $0x28c] ss:$16 sps:$4 sm:$0xff]  }
 0x154   :  { %3263 = vpow2.f32 %v2634_v60  ;;  %v1165_v36 = vadd.f32 1.0, %v3240_v62  ;;  %v3119_v59 = vld [vmem:[#allocation2 + $0x6c] ss:$16 sps:$4 sm:$0xff]  }
 0x155   :  { %3265 = vpow2.f32 %v2633_v57  ;;  %v3114_v57 = vld [vmem:[#allocation2 + $0x288] ss:$16 sps:$4 sm:$0xff]   ;;  %v3122_v62 = vld [vmem:[#allocation2 + $0x26c] ss:$16 sps:$4 sm:$0xff]  }
 0x156   :  { %v3242_v63 = vpop.eup %3241  ;;  %3267 = vpow2.f32 %v2635_v45 }
 0x157   :  { %v3244_v61 = vpop.eup %3243  ;;  %v1164_v55 = vadd.f32 1.0, %v3242_v63  ;;  %3269 = vrcp.f32 %v1163_v47 }
 0x158   :  { %v3246_v29 = vpop.eup %3245  ;;  %v1203_v56 = vmul.f32 %v3244_v61, %v3824_v33  ;;  %3271 = vrcp.f32 %v1165_v36  ;;  %v3101_v33 = vld [vmem:[#allocation2 + $0xcc] ss:$16 sps:$4 sm:$0xff]  }
 0x159   :  { %v3248_v1 = vpop.eup %3247  ;;  %v1205_v19 = vmul.f32 %v3246_v29, %v3827_v43  ;;  %3273 = vrcp.f32 %v1164_v55  ;;  %v3104_v43 = vld [vmem:[#allocation2 + $0x2cc] ss:$16 sps:$4 sm:$0xff]   ;;  %v3117_v29 = vld [vmem:[#allocation2 + $0x68] ss:$16 sps:$4 sm:$0xff]  }
 0x15a   :  { %v3250_v10 = vpop.eup %3249  ;;  %v1204_v12 = vmul.f32 %v3248_v1, %v3836_v2  ;;  %v3123_v55 = vld [vmem:[#allocation2 + $0x48] ss:$16 sps:$4 sm:$0xff]  }
 0x15b   :  { %v3252_v5 = vpop.eup %3251  ;;  %v1206_v50 = vmul.f32 %v3250_v10, %v3839_v3  ;;  %v3120_v10 = vld [vmem:[#allocation2 + $0x268] ss:$16 sps:$4 sm:$0xff]  }
 0x15c   :  { %v3254_v4 = vpop.eup %3253  ;;  %v1166_v2 = vadd.f32 1.0, %v3252_v5  ;;  %v3125_v5 = vld [vmem:[#allocation2 + $0x4c] ss:$16 sps:$4 sm:$0xff]  }
 0x15d   :  { %v3256_v6 = vpop.eup %3255  ;;  %v1207_v9 = vmul.f32 %v3254_v4, %v3847_v14 }
 0x15e   :  { %v3258_v8 = vpop.eup %3257  ;;  %v1209_v28 = vmul.f32 %v3256_v6, %v3850_v7  ;;  %v3128_v6 = vld [vmem:[#allocation2 + $0x24c] ss:$16 sps:$4 sm:$0xff]  }
 0x15f   :  { %v3260_v11 = vpop.eup %3259  ;;  %v1208_v13 = vmul.f32 %v3258_v8, %v3857_v24  ;;  %v3922_v22 = vpack.c.bf16 %v1207_v9, %v1203_v56 }
 0x160   :  { %v3262_v16 = vpop.eup %3261  ;;  %v1210_v34 = vmul.f32 %v3260_v11, %v3860_v27  ;;  %v3926_v37 = vpack.c.bf16 %v1209_v28, %v1205_v19  ;;  %v3140_v19 = vld [vmem:[#allocation2 + $0x20c] ss:$16 sps:$4 sm:$0xff]  }
 0x161   :  { %v1167_v14 = vadd.f32 1.0, %v3262_v16  ;;  %v3920_v21 = vpack.c.bf16 %v1208_v13, %v1204_v12  ;;  %v3264_v7 = vpop.eup %3263 }
 0x162   :  { %v3924_v24 = vpack.c.bf16 %v1210_v34, %v1206_v50  ;;  %v1169_v3 = vadd.f32 1.0, %v3264_v7  ;;  %v3266_v27 = vpop.eup %3265  ;;  %v3132_v34 = vld [vmem:[#allocation2 + $0x228] ss:$16 sps:$4 sm:$0xff]  }
 0x163   :  { %1920 = vmatprep.mubr.bf16.mxu0 %v3920_v21  ;;  %3275 = vrcp.f32 %v1167_v14  ;;  %v3268_v25 = vpop.eup %3267  ;;  %v1168_v17 = vadd.f32 1.0, %v3266_v27  ;;  %v3135_v14 = vld [vmem:[#allocation2 + $0x8] ss:$16 sps:$4 sm:$0xff]  }
 0x164   :  { %1973 = vmatprep.mubr.bf16.mxu1 %v3924_v24  ;;  %1921 = vmatmul.mubr.bf16.vlgmr.msra.gmra.mxu0 %v3922_v22  ;;  %3277 = vrcp.f32 %v1169_v3  ;;  %v1170_v30 = vadd.f32 1.0, %v3268_v25  ;;  %v3270_v60 = vpop.eup %3269  ;;  %v3138_v7 = vld [vmem:[#allocation2 + $0x208] ss:$16 sps:$4 sm:$0xff]   ;;  %v3158_v25 = vld [vmem:[#allocation2 + $0x3ac] ss:$16 sps:$4 sm:$0xff]  }
 0x165   :  { %1974 = vmatmul.mubr.bf16.vlgmr.msra.gmra.mxu1 %v3926_v37  ;;  %1995 = vmatpush1.bf16.msra.mxu0 %v3093_v51  ;;  %3279 = vrcp.f32 %v1166_v2  ;;  %v3272_v45 = vpop.eup %3271  ;;  %v1211_v16 = vmul.f32 %v3270_v60, %v3869_v26  ;;  %v3129_v26 = vld [vmem:[#allocation2 + $0x28] ss:$16 sps:$4 sm:$0xff]   ;;  %v3143_v51 = vld [vmem:[#allocation2 + $0x1ec] ss:$16 sps:$4 sm:$0xff]  }
 0x166   :  { %2048 = vmatpush1.bf16.msra.mxu1 %v3096_v23  ;;  %1996 = vmatprep.subr.bf16.mxu0 %v3101_v33  ;;  %3281 = vrcp.f32 %v1168_v17  ;;  %v3274_v63 = vpop.eup %3273  ;;  %v3146_v2 = vld [vmem:[#allocation2 + $0x3ec] ss:$16 sps:$4 sm:$0xff]   ;;  %v3141_v23 = vld [vmem:[#allocation2 + $0x1e8] ss:$16 sps:$4 sm:$0xff]  }
 0x167   :  { %2049 = vmatprep.subr.bf16.mxu1 %v3104_v43  ;;  %3283 = vrcp.f32 %v1170_v30  ;;  %v1212_v36 = vmul.f32 %v3274_v63, %v3886_v35  ;;  %v3144_v33 = vld [vmem:[#allocation2 + $0x3e8] ss:$16 sps:$4 sm:$0xff]   ;;  %v3155_v43 = vld [vmem:[#allocation2 + $0x1ac] ss:$16 sps:$4 sm:$0xff]  }
 0x168   :  { %v3147_v3 = vld [vmem:[#allocation2 + $0x1c8] ss:$16 sps:$4 sm:$0xff]   ;;  %v3176_v60 = vld [vmem:[#allocation2 + $0x34c] ss:$16 sps:$4 sm:$0xff]  }
 0x169   :  { %1997 = vmatpush1.bf16.msra.mxu0 %v3099_v18  ;;  %v3150_v27 = vld [vmem:[#allocation2 + $0x3c8] ss:$16 sps:$4 sm:$0xff]   ;;  %v3161_v18 = vld [vmem:[#allocation2 + $0x18c] ss:$16 sps:$4 sm:$0xff]  }
 0x16a   :  { %2050 = vmatpush1.bf16.msra.mxu1 %v3102_v38  ;;  %1998 = vmatprep.subr.bf16.mxu0 %v3107_v53  ;;  %v3153_v17 = vld [vmem:[#allocation2 + $0x1a8] ss:$16 sps:$4 sm:$0xff]   ;;  %v3164_v38 = vld [vmem:[#allocation2 + $0x38c] ss:$16 sps:$4 sm:$0xff]  }
 0x16b   :  { %2051 = vmatprep.subr.bf16.mxu1 %v3110_v46  ;;  %v3156_v30 = vld [vmem:[#allocation2 + $0x3a8] ss:$16 sps:$4 sm:$0xff]   ;;  %v3167_v46 = vld [vmem:[#allocation2 + $0x16c] ss:$16 sps:$4 sm:$0xff]  }
 0x16c   :  { %v3159_v53 = vld [vmem:[#allocation2 + $0x188] ss:$16 sps:$4 sm:$0xff]  }
 0x16d   :  { %1999 = vmatpush1.bf16.msra.mxu0 %v3105_v52  ;;  %v3162_v52 = vld [vmem:[#allocation2 + $0x388] ss:$16 sps:$4 sm:$0xff]  }
 0x16e   :  { %2052 = vmatpush1.bf16.msra.mxu1 %v3108_v54  ;;  %2000 = vmatprep.subr.bf16.mxu0 %v3113_v0  ;;  %v3170_v54 = vld [vmem:[#allocation2 + $0x36c] ss:$16 sps:$4 sm:$0xff]   ;;  %v3165_v0 = vld [vmem:[#allocation2 + $0x168] ss:$16 sps:$4 sm:$0xff]  }
 0x16f   :  { %2053 = vmatprep.subr.bf16.mxu1 %v3116_v32  ;;  %v3173_v32 = vld [vmem:[#allocation2 + $0x14c] ss:$16 sps:$4 sm:$0xff]   ;;  %v3177_v63 = vld [vmem:[#allocation2 + $0x128] ss:$16 sps:$4 sm:$0xff]  }
 0x170   :  { %v3276_v61 = vpop.eup %3275 }
 0x171   :  { %2001 = vmatpush1.bf16.msra.mxu0 %v3111_v20  ;;  %v3278_v1 = vpop.eup %3277  ;;  %v1215_v8 = vmul.f32 %v3276_v61, %v3897_v15  ;;  %v1213_v15 = vmul.f32 %v3272_v45, %v3876_v48  ;;  %v3137_v48 = vld [vmem:[#allocation2 + $0xc] ss:$16 sps:$4 sm:$0xff]   ;;  %v3168_v20 = vld [vmem:[#allocation2 + $0x368] ss:$16 sps:$4 sm:$0xff]  }
 0x172   :  { %2054 = vmatpush1.bf16.msra.mxu1 %v3114_v57  ;;  %2002 = vmatprep.subr.bf16.mxu0 %v3119_v59  ;;  %v3280_v4 = vpop.eup %3279  ;;  %v1217_v28 = vmul.f32 %v3278_v1, %v3900_v31  ;;  %v3126_v31 = vld [vmem:[#allocation2 + $0x248] ss:$16 sps:$4 sm:$0xff]   ;;  %v3179_v59 = vld [vmem:[#allocation2 + $0x12c] ss:$16 sps:$4 sm:$0xff]  }
 0x173   :  { %2055 = vmatprep.subr.bf16.mxu1 %v3122_v62  ;;  %v3282_v47 = vpop.eup %3281  ;;  %v1214_v12 = vmul.f32 %v3280_v4, %v3890_v49  ;;  %v3131_v49 = vld [vmem:[#allocation2 + $0x2c] ss:$16 sps:$4 sm:$0xff]   ;;  %v3171_v57 = vld [vmem:[#allocation2 + $0x148] ss:$16 sps:$4 sm:$0xff]  }
 0x174   :  { %v3284_v9 = vpop.eup %3283  ;;  %v1216_v11 = vmul.f32 %v3282_v47, %v3904_v58  ;;  %v3944_v58 = vpack.c.bf16 %v1215_v8, %v1211_v16  ;;  %v3947_v50 = vpack.c.bf16 %v1217_v28, %v1213_v15  ;;  %v3174_v45 = vld [vmem:[#allocation2 + $0x348] ss:$16 sps:$4 sm:$0xff]   ;;  %v3182_v62 = vld [vmem:[#allocation2 + $0x32c] ss:$16 sps:$4 sm:$0xff]   ;;  %v3191_v47 = vld [vmem:[#allocation5 + $0x70] sm:$0xff]  }
 0x175   :  { %2003 = vmatpush1.bf16.msra.mxu0 %v3117_v29  ;;  %v1218_v13 = vmul.f32 %v3284_v9, %v3907_v44  ;;  %v3134_v44 = vld [vmem:[#allocation2 + $0x22c] ss:$16 sps:$4 sm:$0xff]   ;;  %v3180_v29 = vld [vmem:[#allocation2 + $0x328] ss:$16 sps:$4 sm:$0xff]   ;;  %v3192_v8 = vld [vmem:[#allocation5 + $0x30] sm:$0xff]  }
 0x176   :  { %2056 = vmatpush1.bf16.msra.mxu1 %v3120_v10  ;;  %2004 = vmatprep.subr.bf16.mxu0 %v3125_v5  ;;  %v3939_v56 = vpack.c.bf16 %v1216_v11, %v1212_v36  ;;  %v3185_v61 = vld [vmem:[#allocation2 + $0x10c] ss:$16 sps:$4 sm:$0xff]   ;;  %v3183_v10 = vld [vmem:[#allocation2 + $0x108] ss:$16 sps:$4 sm:$0xff]   ;;  %v3195_v36 = vld [vmem:[#allocation5 + $0x60] sm:$0xff]  }
 0x177   :  { %2057 = vmatprep.subr.bf16.mxu1 %v3128_v6  ;;  %v3942_v35 = vpack.c.bf16 %v1218_v13, %v1214_v12  ;;  %v3188_v1 = vld [vmem:[#allocation2 + $0x30c] ss:$16 sps:$4 sm:$0xff]   ;;  %v3186_v5 = vld [vmem:[#allocation2 + $0x308] ss:$16 sps:$4 sm:$0xff]   ;;  %v3200_v12 = vld [vmem:[#allocation5 + $0x10] sm:$0xff]  }
 0x178   :  { %1930 = vmatprep.mubr.bf16.mxu0 %v3939_v56  ;;  %v3189_v4 = vld [vmem:[#allocation5 + $0x78] sm:$0xff]   ;;  %v3193_v9 = vld [vmem:[#allocation5 + $0x68] sm:$0xff]   ;;  %v3204_v15 = vld [vmem:[#allocation5] sm:$0xff]  }
 0x179   :  { %2005 = vmatpush1.bf16.msra.mxu0 %v3123_v55  ;;  %1983 = vmatprep.mubr.bf16.mxu1 %v3942_v35  ;;  %v3190_v6 = vld [vmem:[#allocation5 + $0x38] sm:$0xff]   ;;  %v3199_v55 = vld [vmem:[#allocation5 + $0x50] sm:$0xff]   ;;  %v3201_v13 = vld [vmem:[#allocation5 + $0x48] sm:$0xff]  }
 0x17a   :  { %1931 = vmatmul.mubr.bf16.gmra.mxu0 %v3944_v58  ;;  %1984 = vmatmul.mubr.bf16.gmra.mxu1 %v3947_v50  ;;  %v3197_v11 = vld [vmem:[#allocation5 + $0x58] sm:$0xff]   ;;  %v3202_v16 = vld [vmem:[#allocation5 + $0x8] sm:$0xff]  }
 0x17b   :  { %2026 = vmatprep.mubr.bf16.mxu0 %v3920_v21  ;;  %2079 = vmatprep.mubr.bf16.mxu1 %v3924_v24  ;;  %v3149_v21 = vld [vmem:[#allocation2 + $0x1cc] ss:$16 sps:$4 sm:$0xff]  }
 0x17c   :  { %2058 = vmatpush1.bf16.msra.mxu1 %v3126_v31  ;;  %2006 = vmatprep.subr.bf16.mxu0 %v3131_v49  ;;  %v3152_v24 = vld [vmem:[#allocation2 + $0x3cc] ss:$16 sps:$4 sm:$0xff]   ;;  %v3207_v31 = vld [vmem:[#allocation5 + $0xf0] sm:$0xff]  }
 0x17d   :  { %2059 = vmatprep.subr.bf16.mxu1 %v3134_v44  ;;  %2007 = vmatpush1.bf16.msra.mxu0 %v3129_v26  ;;  %v3198_v28 = vld [vmem:[#allocation5 + $0x18] sm:$0xff]   ;;  %v3209_v49 = vld [vmem:[#allocation5 + $0xe8] sm:$0xff]   ;;  %v3211_v26 = vld [vmem:[#allocation5 + $0xe0] sm:$0xff]  }
 0x17e   :  { %2008 = vmatprep.subr.bf16.mxu0 %v3137_v48  ;;  %v3210_v44 = vld [vmem:[#allocation5 + $0xa8] sm:$0xff]   ;;  %v3212_v48 = vld [vmem:[#allocation5 + $0xa0] sm:$0xff]  }
 0x180   :  { %2060 = vmatpush1.bf16.msra.mxu1 %v3132_v34  ;;  %v3213_v34 = vld [vmem:[#allocation5 + $0xd8] sm:$0xff]  }
 0x181   :  { %2061 = vmatprep.subr.bf16.mxu1 %v3140_v19  ;;  %2009 = vmatpush1.bf16.msra.mxu0 %v3135_v14  ;;  %v3214_v19 = vld [vmem:[#allocation5 + $0x98] sm:$0xff]   ;;  %v3215_v14 = vld [vmem:[#allocation5 + $0xd0] sm:$0xff]  }
 0x182   :  { %2010 = vmatprep.subr.bf16.mxu0 %v3143_v51  ;;  %v3216_v51 = vld [vmem:[#allocation5 + $0x90] sm:$0xff]  }
 0x184   :  { %2062 = vmatpush1.bf16.msra.mxu1 %v3138_v7  ;;  %v3217_v7 = vld [vmem:[#allocation5 + $0xc8] sm:$0xff]  }
 0x185   :  { %2063 = vmatprep.subr.bf16.mxu1 %v3146_v2  ;;  %2011 = vmatpush2.bf16.msra.mxu0 %v3141_v23  ;;  %v3218_v2 = vld [vmem:[#allocation5 + $0x88] sm:$0xff]   ;;  %v3219_v23 = vld [vmem:[#allocation5 + $0xc0] sm:$0xff]  }
 0x186   :  { %2012 = vmatprep.subr.bf16.mxu0 %v3149_v21  ;;  %v3220_v21 = vld [vmem:[#allocation5 + $0x80] sm:$0xff]  }
 0x188   :  { %2064 = vmatpush2.bf16.msra.mxu1 %v3144_v33  ;;  %v3963_v33 = vld [vmem:[%s4003_s8] sm:$0xf] }
 0x189   :  { %2065 = vmatprep.subr.bf16.mxu1 %v3152_v24  ;;  %2013 = vmatpush2.bf16.msra.mxu0 %v3147_v3  ;;  %v1231_v24 = vrot.slane %v3963_v33, %v3753_v39  ;;  %v1235_v3 = vrot.slane %v3963_v33, %v3757_v41 }
 0x18a   :  { %2014 = vmatprep.subr.bf16.mxu0 %v3155_v43 }
 0x18c   :  { %2066 = vmatpush2.bf16.msra.mxu1 %v3150_v27 }
 0x18d   :  { %2067 = vmatprep.subr.bf16.mxu1 %v3158_v25  ;;  %2015 = vmatpush2.bf16.msra.mxu0 %v3153_v17 }
 0x18e   :  { %2016 = vmatprep.subr.bf16.mxu0 %v3161_v18 }
 0x190   :  { %2068 = vmatpush2.bf16.msra.mxu1 %v3156_v30 }
 0x191   :  { %2069 = vmatprep.subr.bf16.mxu1 %v3164_v38  ;;  %2017 = vmatpush2.bf16.msra.mxu0 %v3159_v53 }
 0x192   :  { %2018 = vmatprep.subr.bf16.mxu0 %v3167_v46 }
 0x194   :  { %2070 = vmatpush2.bf16.msra.mxu1 %v3162_v52 }
 0x195   :  { %2071 = vmatprep.subr.bf16.mxu1 %v3170_v54  ;;  %2019 = vmatpush2.bf16.msra.mxu0 %v3165_v0 }
 0x196   :  { %2020 = vmatprep.subr.bf16.mxu0 %v3173_v32 }
 0x198   :  { %2072 = vmatpush2.bf16.msra.mxu1 %v3168_v20 }
 0x199   :  { %2073 = vmatprep.subr.bf16.mxu1 %v3176_v60  ;;  %2021 = vmatpush2.bf16.msra.mxu0 %v3171_v57 }
 0x19a   :  { %2022 = vmatprep.subr.bf16.mxu0 %v3179_v59 }
 0x19c   :  { %2074 = vmatpush2.bf16.msra.mxu1 %v3174_v45 }
 0x19d   :  { %2075 = vmatprep.subr.bf16.mxu1 %v3182_v62  ;;  %2023 = vmatpush2.bf16.msra.mxu0 %v3177_v63 }
 0x19e   :  { %2024 = vmatprep.subr.bf16.mxu0 %v3185_v61 }
 0x1a0   :  { %2076 = vmatpush2.bf16.msra.mxu1 %v3180_v29 }
 0x1a1   :  { %2077 = vmatprep.subr.bf16.mxu1 %v3188_v1  ;;  %2025 = vmatpush2.bf16.msra.mxu0 %v3183_v10 }
 0x1a2   :  { %2813 = vmatprep.subr.bf16.mxu0 %v3189_v4 }
 0x1a4   :  { %2078 = vmatpush2.bf16.msra.mxu1 %v3186_v5  ;;  %2027 = vmatmul.mubr.bf16.vlgmr.msra.gmra.mxu0 %v3922_v22  ;;  %v3194_v22 = vld [vmem:[#allocation5 + $0x28] sm:$0xff]  }
 0x1a5   :  { %2036 = vmatprep.mubr.bf16.mxu0 %v3939_v56  ;;  %2814 = vmatpush3.bf16.msra.mxu0 %v3190_v6  ;;  %v3203_v56 = vld [vmem:[#allocation5 + $0x40] sm:$0xff]  }
 0x1a6   :  { %2815 = vmatprep.subr.bf16.mxu0 %v3191_v47 }
 0x1a7   :  { %2080 = vmatmul.mubr.bf16.vlgmr.msra.gmra.mxu1 %v3926_v37  ;;  %v3196_v37 = vld [vmem:[#allocation5 + $0x20] sm:$0xff]  }
 0x1a8   :  { %2089 = vmatprep.mubr.bf16.mxu1 %v3942_v35  ;;  %v3205_v35 = vld [vmem:[#allocation5 + $0xf8] sm:$0xff]  }
 0x1a9   :  { %2816 = vmatpush3.bf16.msra.mxu0 %v3192_v8  ;;  %2841 = vmatprep.subr.bf16.mxu1 %v3205_v35 }
 0x1aa   :  { %2817 = vmatprep.subr.bf16.mxu0 %v3193_v9 }
 0x1ac   :  { %2037 = vmatmul.mubr.bf16.gmra.mxu0 %v3944_v58  ;;  %v3206_v58 = vld [vmem:[#allocation5 + $0xb8] sm:$0xff]  }
 0x1ad   :  { %2818 = vmatpush3.bf16.msra.mxu0 %v3194_v22  ;;  %2842 = vmatpush3.bf16.msra.mxu1 %v3206_v58 }
 0x1ae   :  { %2819 = vmatprep.subr.bf16.mxu0 %v3195_v36  ;;  %2843 = vmatprep.subr.bf16.mxu1 %v3207_v31 }
 0x1af   :  { %2090 = vmatmul.mubr.bf16.gmra.mxu1 %v3947_v50  ;;  %v3208_v50 = vld [vmem:[#allocation5 + $0xb0] sm:$0xff]  }
 0x1b1   :  { %2820 = vmatpush3.bf16.msra.mxu0 %v3196_v37  ;;  %2844 = vmatpush3.bf16.msra.mxu1 %v3208_v50 }
 0x1b2   :  { %2821 = vmatprep.subr.bf16.mxu0 %v3197_v11  ;;  %2845 = vmatprep.subr.bf16.mxu1 %v3209_v49 }
 0x1b5   :  { %2822 = vmatpush3.bf16.msra.mxu0 %v3198_v28  ;;  %2846 = vmatpush3.bf16.msra.mxu1 %v3210_v44 }
 0x1b6   :  { %2823 = vmatprep.subr.bf16.mxu0 %v3199_v55  ;;  %2847 = vmatprep.subr.bf16.mxu1 %v3211_v26 }
 0x1b9   :  { %2824 = vmatpush3.bf16.msra.mxu0 %v3200_v12  ;;  %2848 = vmatpush3.bf16.msra.mxu1 %v3212_v48 }
 0x1ba   :  { %2825 = vmatprep.subr.bf16.mxu0 %v3201_v13  ;;  %2849 = vmatprep.subr.bf16.mxu1 %v3213_v34 }
 0x1bd   :  { %2826 = vmatpush3.bf16.msra.mxu0 %v3202_v16  ;;  %2850 = vmatpush3.bf16.msra.mxu1 %v3214_v19 }
 0x1be   :  { %2827 = vmatprep.subr.bf16.mxu0 %v3203_v56  ;;  %2851 = vmatprep.subr.bf16.mxu1 %v3215_v14 }
 0x1c1   :  { %2828 = vmatpush3.bf16.msra.mxu0 %v3204_v15  ;;  %2852 = vmatpush3.bf16.msra.mxu1 %v3216_v51 }
 0x1c2   :  { %2853 = vmatprep.subr.bf16.mxu1 %v3217_v7 }
 0x1c5   :  { %2854 = vmatpush3.bf16.msra.mxu1 %v3218_v2 }
 0x1c6   :  { %2855 = vmatprep.subr.bf16.mxu1 %v3219_v23 }
 0x1c9   :  { %2856 = vmatpush3.bf16.msra.mxu1 %v3220_v21 }
 0x224   :  { %v1922_v43 = vpop.f32.mrf.mxu0 }
 0x225   :  { %v1923_v27 = vadd.f32 %v1922_v43, %v1231_v24  ;;  %v1975_v25 = vpop.f32.mrf.mxu1 }
 0x226   :  { %v1924_v17 = vpop.f32.mrf.mxu0 }
 0x227   :  { %v3969_v18 = vadd.f32 %v1975_v25, %v1923_v27  ;;  %v1925_v30 = vadd.f32 %v1924_v17, %v1235_v3  ;;  %v1977_v38 = vpop.f32.mrf.mxu1 }
 0x228   :  { %v1926_v53 = vpop.f32.mrf.mxu0 }
 0x229   :  { %v2764_v46 = vmul.f32 -1.442695, %v3969_v18  ;;  %v1978_v52 = vadd.f32 %v1977_v38, %v1925_v30  ;;  %v1927_v54 = vadd.f32 %v1926_v53, %v1231_v24  ;;  %v1979_v0 = vpop.f32.mrf.mxu1 }
 0x22a   :  { %v1928_v32 = vpop.f32.mrf.mxu0 }
 0x22b   :  { %v2765_v20 = vmul.f32 -1.442695, %v1978_v52  ;;  %v1980_v39 = vadd.f32 %v1979_v0, %v1927_v54  ;;  %v1929_v60 = vadd.f32 %v1928_v32, %v1235_v3  ;;  %3285 = vpow2.f32 %v2764_v46  ;;  %v1981_v41 = vpop.f32.mrf.mxu1 }
 0x22c   :  { %v1239_v46 = vrot.slane %v3963_v33, %v3755_v40  ;;  %v1243_v0 = vrot.slane %v3963_v33, %v3759_v42 }
 0x22d   :  { %3287 = vpow2.f32 %v2765_v20  ;;  %v2768_v57 = vmul.f32 -1.442695, %v1980_v39  ;;  %v1982_v59 = vadd.f32 %v1981_v41, %v1929_v60 }
 0x22f   :  { %3289 = vpow2.f32 %v2768_v57  ;;  %v2769_v45 = vmul.f32 -1.442695, %v1982_v59 }
 0x231   :  { %3291 = vpow2.f32 %v2769_v45 }
 0x238   :  { %v3286_v62 = vpop.eup %3285 }
 0x239   :  { %v2148_v4 = vadd.f32 1.0, %v3286_v62 }
 0x23a   :  { %v3288_v63 = vpop.eup %3287  ;;  %v1932_v61 = vpop.f32.mrf.mxu0 }
 0x23b   :  { %v2149_v29 = vadd.f32 1.0, %v3288_v63  ;;  %v1933_v1 = vadd.f32 %v1932_v61, %v1231_v24  ;;  %v1985_v10 = vpop.f32.mrf.mxu1 }
 0x23c   :  { %v3290_v5 = vpop.eup %3289  ;;  %v1934_v6 = vpop.f32.mrf.mxu0 }
 0x23d   :  { %v2152_v47 = vadd.f32 1.0, %v3290_v5  ;;  %v1986_v8 = vadd.f32 %v1985_v10, %v1933_v1  ;;  %v1935_v9 = vadd.f32 %v1934_v6, %v1235_v3  ;;  %v1987_v22 = vpop.f32.mrf.mxu1  ;;  %3293 = vrcp.f32 %v2149_v29 }
 0x23e   :  { %v3292_v36 = vpop.eup %3291  ;;  %v1936_v37 = vpop.f32.mrf.mxu0 }
 0x23f   :  { %3295 = vrcp.f32 %v2152_v47  ;;  %v2153_v11 = vadd.f32 1.0, %v3292_v36  ;;  %v2772_v28 = vmul.f32 -1.442695, %v1986_v8  ;;  %v1988_v55 = vadd.f32 %v1987_v22, %v1935_v9  ;;  %v1989_v12 = vpop.f32.mrf.mxu1 }
 0x240   :  { %3297 = vrcp.f32 %v2148_v4  ;;  %v1937_v13 = vadd.f32 %v1936_v37, %v1231_v24  ;;  %v1938_v16 = vpop.f32.mrf.mxu0 }
 0x241   :  { %3299 = vrcp.f32 %v2153_v11  ;;  %v2773_v56 = vmul.f32 -1.442695, %v1988_v55  ;;  %v1939_v15 = vadd.f32 %v1938_v16, %v1235_v3  ;;  %v1991_v58 = vpop.f32.mrf.mxu1 }
 0x242   :  { %3301 = vpow2.f32 %v2772_v28  ;;  %v1990_v35 = vadd.f32 %v1989_v12, %v1937_v13 }
 0x243   :  { %3303 = vpow2.f32 %v2773_v56  ;;  %v1992_v31 = vadd.f32 %v1991_v58, %v1939_v15 }
 0x244   :  { %v2776_v50 = vmul.f32 -1.442695, %v1990_v35 }
 0x245   :  { %v2777_v49 = vmul.f32 -1.442695, %v1992_v31 }
 0x246   :  { %3305 = vpow2.f32 %v2776_v50 }
 0x247   :  { %3307 = vpow2.f32 %v2777_v49 }
 0x24a   :  { %v3294_v44 = vpop.eup %3293 }
 0x24b   :  { %v2197_v51 = vmul.f32 %v3294_v44, %v1978_v52 }
 0x24c   :  { %v3296_v26 = vpop.eup %3295 }
 0x24d   :  { %v3298_v48 = vpop.eup %3297  ;;  %v2200_v19 = vmul.f32 %v3296_v26, %v1980_v39 }
 0x24e   :  { %v3300_v34 = vpop.eup %3299  ;;  %v2196_v23 = vmul.f32 %v3298_v48, %v3969_v18 }
 0x24f   :  { %v3302_v14 = vpop.eup %3301  ;;  %v2201_v7 = vmul.f32 %v3300_v34, %v1982_v59 }
 0x250   :  { %v3304_v2 = vpop.eup %3303  ;;  %v2156_v21 = vadd.f32 1.0, %v3302_v14  ;;  %v2212_v43 = vpack.c.bf16 %v2200_v19, %v2196_v23 }
 0x251   :  { %v2157_v24 = vadd.f32 1.0, %v3304_v2  ;;  %v2213_v3 = vpack.c.bf16 %v2201_v7, %v2197_v51 }
 0x252   :  { %3309 = vrcp.f32 %v2156_v21 }
 0x253   :  { %v3306_v27 = vpop.eup %3305  ;;  %2450 = vmatprep.mubr.bf16.mxu0 %v2213_v3  ;;  %3311 = vrcp.f32 %v2157_v24 }
 0x254   :  { %v3308_v25 = vpop.eup %3307  ;;  %v2160_v17 = vadd.f32 1.0, %v3306_v27  ;;  %2451 = vmatmul.mubr.bf16.vlgmr.msra.gmra.mxu0 %v2212_v43 }
 0x255   :  { %v2161_v30 = vadd.f32 1.0, %v3308_v25 }
 0x256   :  { %3313 = vrcp.f32 %v2160_v17 }
 0x257   :  { %3315 = vrcp.f32 %v2161_v30 }
 0x25f   :  { %v3310_v38 = vpop.eup %3309 }
 0x260   :  { %v3312_v53 = vpop.eup %3311  ;;  %v2204_v60 = vmul.f32 %v3310_v38, %v1986_v8 }
 0x261   :  { %v2205_v32 = vmul.f32 %v3312_v53, %v1988_v55 }
 0x263   :  { %v3314_v18 = vpop.eup %3313 }
 0x264   :  { %v3316_v52 = vpop.eup %3315  ;;  %v2208_v54 = vmul.f32 %v3314_v18, %v1990_v35  ;;  %v2028_v39 = vpop.f32.mrf.mxu0 }
 0x265   :  { %v2209_v20 = vmul.f32 %v3316_v52, %v1992_v31  ;;  %v2029_v41 = vadd.f32 %v2028_v39, %v1239_v46 }
 0x266   :  { %v2030_v45 = vpop.f32.mrf.mxu0  ;;  %v2216_v62 = vpack.c.bf16 %v2208_v54, %v2204_v60 }
 0x267   :  { %v2217_v57 = vpack.c.bf16 %v2209_v20, %v2205_v32  ;;  %v2081_v59 = vpop.f32.mrf.mxu1  ;;  %v2031_v61 = vadd.f32 %v2030_v45, %v1243_v0 }
 0x268   :  { %v3977_v63 = vadd.f32 %v2081_v59, %v2029_v41  ;;  %v2032_v29 = vpop.f32.mrf.mxu0 }
 0x269   :  { %2458 = vmatprep.mubr.bf16.mxu0 %v2217_v57  ;;  %v2083_v40 = vpop.f32.mrf.mxu1  ;;  %v2033_v42 = vadd.f32 %v2032_v29, %v1239_v46 }
 0x26a   :  { %2459 = vmatmul.mubr.bf16.gmra.mxu0 %v2216_v62  ;;  %v2766_v1 = vmul.f32 -1.442695, %v3977_v63  ;;  %v3980_v10 = vadd.f32 %v2083_v40, %v2031_v61  ;;  %v2034_v5 = vpop.f32.mrf.mxu0 }
 0x26b   :  { %v2085_v33 = vpop.f32.mrf.mxu1  ;;  %v2035_v47 = vadd.f32 %v2034_v5, %v1243_v0 }
 0x26c   :  { %v2767_v4 = vmul.f32 -1.442695, %v3980_v10  ;;  %v2086_v6 = vadd.f32 %v2085_v33, %v2033_v42  ;;  %3317 = vpow2.f32 %v2766_v1  ;;  %v2038_v9 = vpop.f32.mrf.mxu0 }
 0x26d   :  { %v2087_v8 = vpop.f32.mrf.mxu1  ;;  %v2039_v37 = vadd.f32 %v2038_v9, %v1239_v46 }
 0x26e   :  { %3319 = vpow2.f32 %v2767_v4  ;;  %v2770_v22 = vmul.f32 -1.442695, %v2086_v6  ;;  %v2088_v36 = vadd.f32 %v2087_v8, %v2035_v47  ;;  %v2040_v28 = vpop.f32.mrf.mxu0 }
 0x26f   :  { %v2091_v11 = vpop.f32.mrf.mxu1  ;;  %v2041_v13 = vadd.f32 %v2040_v28, %v1243_v0 }
 0x270   :  { %3321 = vpow2.f32 %v2770_v22  ;;  %v2771_v55 = vmul.f32 -1.442695, %v2088_v36  ;;  %v3983_v12 = vadd.f32 %v2091_v11, %v2039_v37  ;;  %v2042_v56 = vpop.f32.mrf.mxu0  ;;  %v2780_v22 = vld [vmem:[%s4005_s10] ss:$0 sm:$0xff]  ;;  %s3422_s10 = smov [#allocation7]  }
 0x271   :  { %v2093_v16 = vpop.f32.mrf.mxu1  ;;  %v2043_v58 = vadd.f32 %v2042_v56, %v1239_v46  ;;  %s2525_s5 = sshll.u32 %s3422_s10, 4  ;;  %s2526_s5 = int_to_ptr.vmem [resolvable:$true] %s2525_s5 }
 0x272   :  { %3323 = vpow2.f32 %v2771_v55  ;;  %v2774_v15 = vmul.f32 -1.442695, %v3983_v12  ;;  %v2094_v35 = vadd.f32 %v2093_v16, %v2041_v13  ;;  %v2044_v50 = vpop.f32.mrf.mxu0  ;;  %s3389_s27 = scalar_lea.vmem %s2526_s5, 512  ;;  %p3394_p11 = scmp.lt.s32.totalorder %s2526_s5, %s2526_s5 }
 0x273   :  { %v2095_v31 = vpop.f32.mrf.mxu1  ;;  %v2045_v26 = vadd.f32 %v2044_v50, %v1243_v0  ;;  %p3390_p10 = scmp.ne.s32.totalorder %s2526_s5, %s3389_s27  ;;  %p3395_p12 = scmp.lt.s32.totalorder %s3389_s27, %s3389_s27 }
 0x274   :  { %v2775_v49 = vmul.f32 -1.442695, %v2094_v35  ;;  %v2096_v44 = vadd.f32 %v2095_v31, %v2043_v58  ;;  %3325 = vpow2.f32 %v2774_v15 }
 0x275   :  { %v2097_v48 = vpop.f32.mrf.mxu1  ;;  %p3396_p13 = por %p3395_p12, %p3394_p11 }
 0x276   :  { %3327 = vpow2.f32 %v2775_v49  ;;  %v2778_v34 = vmul.f32 -1.442695, %v2096_v44  ;;  %v2098_v19 = vadd.f32 %v2097_v48, %v2045_v26 }
 0x277   :  { %p3397_p0 = pnand %p3396_p13, %p3390_p10 }
 0x278   :  { %3329 = vpow2.f32 %v2778_v34  ;;  %v2779_v14 = vmul.f32 -1.442695, %v2098_v19 }
 0x279   :  { %v3318_v51 = vpop.eup %3317 }
 0x27a   :  { %3331 = vpow2.f32 %v2779_v14  ;;  %v2150_v21 = vadd.f32 1.0, %v3318_v51 }
 0x27b   :  { %v3320_v7 = vpop.eup %3319 }
 0x27c   :  { %v2151_v2 = vadd.f32 1.0, %v3320_v7 }
 0x27d   :  { %v3322_v23 = vpop.eup %3321 }
 0x27e   :  { %v2154_v24 = vadd.f32 1.0, %v3322_v23  ;;  %3333 = vrcp.f32 %v2151_v2 }
 0x27f   :  { %v3324_v3 = vpop.eup %3323 }
 0x280   :  { %3335 = vrcp.f32 %v2154_v24  ;;  %v2155_v43 = vadd.f32 1.0, %v3324_v3 }
 0x281   :  { %3337 = vrcp.f32 %v2150_v21  ;;  %v3326_v27 = vpop.eup %3325 }
 0x282   :  { %3339 = vrcp.f32 %v2155_v43  ;;  %v2158_v38 = vadd.f32 1.0, %v3326_v27 }
 0x283   :  { %v3328_v25 = vpop.eup %3327 }
 0x284   :  { %v2159_v17 = vadd.f32 1.0, %v3328_v25 }
 0x285   :  { %v3330_v30 = vpop.eup %3329 }
 0x286   :  { %v2162_v53 = vadd.f32 1.0, %v3330_v30  ;;  %3341 = vrcp.f32 %v2159_v17 }
 0x287   :  { %v3332_v46 = vpop.eup %3331 }
 0x288   :  { %3343 = vrcp.f32 %v2162_v53  ;;  %v2163_v18 = vadd.f32 1.0, %v3332_v46 }
 0x289   :  { %3345 = vrcp.f32 %v2158_v38 }
 0x28a   :  { %3347 = vrcp.f32 %v2163_v18 }
 0x28b   :  { %v3334_v52 = vpop.eup %3333 }
 0x28c   :  { %v2199_v39 = vmul.f32 %v3334_v52, %v3980_v10 }
 0x28d   :  { %v3336_v54 = vpop.eup %3335 }
 0x28e   :  { %v3338_v0 = vpop.eup %3337  ;;  %v2202_v20 = vmul.f32 %v3336_v54, %v2086_v6 }
 0x28f   :  { %v3340_v32 = vpop.eup %3339  ;;  %v2198_v41 = vmul.f32 %v3338_v0, %v3977_v63 }
 0x290   :  { %v2203_v60 = vmul.f32 %v3340_v32, %v2088_v36 }
 0x291   :  { %v2214_v59 = vpack.c.bf16 %v2202_v20, %v2198_v41 }
 0x292   :  { %v2215_v57 = vpack.c.bf16 %v2203_v60, %v2199_v39 }
 0x293   :  { %v3342_v45 = vpop.eup %3341 }
 0x294   :  { %2499 = vmatprep.mubr.bf16.mxu1 %v2215_v57  ;;  %v2207_v1 = vmul.f32 %v3342_v45, %v2094_v35 }
 0x295   :  { %v3344_v62 = vpop.eup %3343  ;;  %2500 = vmatmul.mubr.bf16.vlgmr.msra.gmra.mxu1 %v2214_v59 }
 0x296   :  { %v3346_v61 = vpop.eup %3345  ;;  %v2210_v29 = vmul.f32 %v3344_v62, %v2096_v44 }
 0x297   :  { %v3348_v40 = vpop.eup %3347  ;;  %v2206_v33 = vmul.f32 %v3346_v61, %v3983_v12 }
 0x298   :  { %v2211_v42 = vmul.f32 %v3348_v40, %v2098_v19 }
 0x299   :  { %v2218_v4 = vpack.c.bf16 %v2210_v29, %v2206_v33 }
 0x29a   :  { %v2219_v5 = vpack.c.bf16 %v2211_v42, %v2207_v1 }
 0x29c   :  { %2507 = vmatprep.mubr.bf16.mxu1 %v2219_v5 }
 0x29d   :  { %2508 = vmatmul.mubr.bf16.gmra.mxu1 %v2218_v4 }
 0x314   :  { %v2829_v10 = vpop.f32.mrf.mxu0 }
 0x316   :  { %v2830_v6 = vpop.f32.mrf.mxu0 }
 0x317   :  { %v2831_v9 = vadd.f32 %v2830_v6, %v2829_v10 }
 0x318   :  { %v2832_v63 = vpop.f32.mrf.mxu0 }
 0x319   :  { %v2453_v28 = vadd.f32 %v2831_v9, %v2780_v22 }
 0x31a   :  { %v2833_v47 = vpop.f32.mrf.mxu0 }
 0x31b   :  { %v2834_v55 = vadd.f32 %v2833_v47, %v2832_v63 }
 0x31d   :  { %v2456_v35 = vadd.f32 %v2834_v55, %v2780_v22 }
 0x32a   :  { %v2835_v8 = vpop.f32.mrf.mxu0 }
 0x32c   :  { %v2836_v36 = vpop.f32.mrf.mxu0 }
 0x32d   :  { %v2837_v58 = vadd.f32 %v2836_v36, %v2835_v8 }
 0x32e   :  { %v2838_v13 = vpop.f32.mrf.mxu0 }
 0x32f   :  { %v2461_v48 = vadd.f32 %v2837_v58, %v2780_v22 }
 0x330   :  { %v2839_v50 = vpop.f32.mrf.mxu0 }
 0x331   :  { %v2840_v34 = vadd.f32 %v2839_v50, %v2838_v13 }
 0x333   :  { %v2464_v2 = vadd.f32 %v2840_v34, %v2780_v22 }
 0x355   :  { %v2857_v37 = vpop.f32.mrf.mxu1 }
 0x357   :  { %v2858_v11 = vpop.f32.mrf.mxu1 }
 0x358   :  { %v2859_v12 = vadd.f32 %v2858_v11, %v2857_v37 }
 0x359   :  { %v2860_v16 = vpop.f32.mrf.mxu1 }
 0x35a   :  { %v2502_v56 = vadd.f32 %v2859_v12, %v2453_v28 }
 0x35b   :  { %v2861_v15 = vpop.f32.mrf.mxu1 }
 0x35c   :  { %2516 = vst [vmem:[#allocation7] sm:$0xff] %v2502_v56  ;;  %v2862_v31 = vadd.f32 %v2861_v15, %v2860_v16 }
 0x35d   :  { %v2863_v49 = vpop.f32.mrf.mxu1 }
 0x35e   :  { %v2505_v44 = vadd.f32 %v2862_v31, %v2456_v35 }
 0x35f   :  { %v2864_v26 = vpop.f32.mrf.mxu1 }
 0x360   :  { %2517 = vst [vmem:[#allocation7 + $0x8] sm:$0xff] %v2505_v44  ;;  %v2865_v19 = vadd.f32 %v2864_v26, %v2863_v49 }
 0x361   :  { %v2866_v14 = vpop.f32.mrf.mxu1 }
 0x362   :  { %v2510_v51 = vadd.f32 %v2865_v19, %v2461_v48 }
 0x363   :  { %v2867_v7 = vpop.f32.mrf.mxu1 }
 0x364   :  { %2518 = vst [vmem:[#allocation7 + $0x10] sm:$0xff] %v2510_v51  ;;  %v2868_v23 = vadd.f32 %v2867_v7, %v2866_v14 }
 0x366   :  { %v2513_v21 = vadd.f32 %v2868_v23, %v2464_v2 }
 0x368   :  { %2519 = vst [vmem:[#allocation7 + $0x18] sm:$0xff] %v2513_v21 }
 0x369   :  { %3400 = shalt.err (!%p3397_p0)
}
 0x36a   :  { %s3423_s28 = smov 128   ;;  %s3424_s2 = smov 8  }
 0x36b   :  { %2531 = dma.vmem_to_hbm [thread:$0]  %s2526_s5, 512, %s4006_s11, [#allocation4], %s3423_s28, %s3423_s28, %s3424_s2  }
 0x36c   :  { %3413 = dma.done.wait [#allocation4], 512  }
 0x36d   :  { %3414 = vsyncadd [#allocation4], 4294966784 }
 0x36e   :  { %2535 = vsyncpa [#allocation3], 1 }
 0x36f   :  { %2536 = vsyncpa [#allocation6], 1 }
 0x370   :  { %2537 = vsyncpa [#allocation4], 1 }

</bundles_post_ra>
